<compile_context>
chip_gen: v7x
topology: tpu7x:2x2x1
jax: 0.10.0
libtpu: 0.0.40
codegen_flags: <defaults>
</compile_context>

<pallas_src>
import jax
import jax.numpy as jnp
from jax.experimental import pallas as pl
from jax.experimental.pallas import tpu as pltpu

LANE = 128


def _round_up(n, m):
    return ((n + m - 1) // m) * m


def _num_tensorcores():
    """v7x has 2 TensorCores per chip; earlier generations have 1."""
    try:
        kind = jax.devices()[0].device_kind.lower()
    except Exception:
        return 1
    return 2 if ("v7" in kind or "7x" in kind) else 1


# ----------------------------------------------------------------------------
# Kernel
# ----------------------------------------------------------------------------
def _mlp_kernel(x_ref, w1_ref, wmid_ref, w5_ref, bhid_ref, b5_ref, o_ref):
    """Fused 5-layer MLP on one batch tile.

    x_ref   : [bm, in_dim]        f32 (cast to bf16 in-kernel)
    w1_ref  : [in_dim, H]         bf16
    wmid_ref: [3, H, H]           bf16 (layers 2..4, stacked)
    w5_ref  : [H, out_dim]        bf16
    bhid_ref: [4, H]              f32  (biases of layers 1..4, stacked)
    b5_ref  : [1, out_dim]        f32
    o_ref   : [bm, out_dim]       f32
    """
    h = x_ref[...].astype(jnp.bfloat16)

    # Layer 1 (K = in_dim, unpadded)
    acc = jnp.dot(h, w1_ref[...], preferred_element_type=jnp.float32)
    acc = acc + bhid_ref[0:1, :]
    h = jnp.maximum(acc, 0.0).astype(jnp.bfloat16)

    # Layers 2..4 (H x H), static unroll over the stacked weights.
    for j in range(wmid_ref.shape[0]):
        acc = jnp.dot(h, wmid_ref[j], preferred_element_type=jnp.float32)
        acc = acc + bhid_ref[j + 1:j + 2, :]
        h = jnp.maximum(acc, 0.0).astype(jnp.bfloat16)

    # Layer 5 (N = out_dim, unpadded), no ReLU.
    acc = jnp.dot(h, w5_ref[...], preferred_element_type=jnp.float32)
    acc = acc + b5_ref[...]
    o_ref[...] = acc.astype(o_ref.dtype)


# ----------------------------------------------------------------------------
# One-time parameter preparation (call ONCE, reuse across forward calls)
# ----------------------------------------------------------------------------
def prepare_params(params, hidden_pad=LANE):
    """Pad hidden dims to 128 lanes, cast weights to bf16, stack layers 2..4.

    params: list of 5 tuples (W [in, out] f32, b [1, out] f32).
    Hidden padding lanes are exactly zero in both W columns and biases, so they
    stay zero through ReLU and contribute nothing downstream (exact result).
    """
    (w1, b1), (w2, b2), (w3, b3), (w4, b4), (w5, b5) = params
    in_dim = w1.shape[0]
    out_dim = w5.shape[1]
    H = hidden_pad

    def pad_w(w, rows, cols):
        return (jnp.zeros((rows, cols), jnp.bfloat16)
                .at[: w.shape[0], : w.shape[1]].set(w.astype(jnp.bfloat16)))

    def pad_b(b, cols):
        return (jnp.zeros((cols,), jnp.float32)
                .at[: b.shape[-1]].set(b.reshape(-1).astype(jnp.float32)))

    prepared = {
        "w1": pad_w(w1, in_dim, H),                                  # [in, 128]
        "wmid": jnp.stack([pad_w(w, H, H) for w in (w2, w3, w4)]),   # [3,128,128]
        "w5": pad_w(w5, H, out_dim),                                 # [128, out]
        "bhid": jnp.stack([pad_b(b, H) for b in (b1, b2, b3, b4)]),  # [4, 128]
        "b5": b5.reshape(1, out_dim).astype(jnp.float32),            # [1, out]
        "in_dim": in_dim,
        "out_dim": out_dim,
        "hidden": H,
    }
    return jax.tree_util.tree_map(
        lambda a: jax.block_until_ready(a) if isinstance(a, jax.Array) else a,
        prepared)


# ----------------------------------------------------------------------------
# Per-call wrapper (only touches x)
# ----------------------------------------------------------------------------
def five_layer_net(x, prepared, block_rows=None, max_block_rows=4096):
    """x: [batch, in_dim] f32. prepared: output of prepare_params()."""
    batch, in_dim = x.shape
    assert in_dim == prepared["in_dim"], (in_dim, prepared["in_dim"])
    out_dim = prepared["out_dim"]
    H = prepared["hidden"]

    # One block per TensorCore (grid=(1,) on v5e/v6e, grid=(2,) on v7x),
    # capped so the tile always fits the default scoped-VMEM limit
    # (no vmem_limit_bytes needed on any chip at the default cap).
    if block_rows is None:
        n_tc = _num_tensorcores()
        bm = -(-batch // n_tc)                      # cdiv
        bm = max(8, min(max_block_rows, _round_up(bm, 8)))
    else:
        bm = block_rows
    batch_pad = _round_up(batch, bm)

    # Common case (batch % bm == 0): no copy, no cast in the wrapper at all.
    x_in = x if batch_pad == batch else jnp.pad(x, ((0, batch_pad - batch), (0, 0)))

    grid = (batch_pad // bm,)
    in_specs = [
        pl.BlockSpec((bm, in_dim), lambda i: (i, 0)),        # x, tiled over batch
        pl.BlockSpec((in_dim, H), lambda i: (0, 0)),         # W1        (resident)
        pl.BlockSpec((3, H, H), lambda i: (0, 0, 0)),        # W2..W4    (resident)
        pl.BlockSpec((H, out_dim), lambda i: (0, 0)),        # W5        (resident)
        pl.BlockSpec((4, H), lambda i: (0, 0)),              # b1..b4    (resident)
        pl.BlockSpec((1, out_dim), lambda i: (0, 0)),        # b5        (resident)
    ]
    out_spec = pl.BlockSpec((bm, out_dim), lambda i: (i, 0))

    y = pl.pallas_call(
        _mlp_kernel,
        out_shape=jax.ShapeDtypeStruct((batch_pad, out_dim), jnp.float32),
        grid=grid,
        in_specs=in_specs,
        out_specs=out_spec,
        compiler_params=pltpu.CompilerParams(
            dimension_semantics=("parallel",)),
    )(x_in, prepared["w1"], prepared["wmid"], prepared["w5"],
      prepared["bhid"], prepared["b5"])

    return y if batch_pad == batch else y[:batch]


# ----------------------------------------------------------------------------
# Init + reference
# ----------------------------------------------------------------------------
def init_linear_params(key, in_dim, out_dim):
    """PyTorch nn.Linear default init: U(-1/sqrt(in), 1/sqrt(in)) for W and b.
    Stored as W [in, out] (transposed vs PyTorch), b [1, out]."""
    kw, kb = jax.random.split(key)
    bound = 1.0 / jnp.sqrt(jnp.float32(in_dim))
    w = jax.random.uniform(kw, (in_dim, out_dim), jnp.float32, -bound, bound)
    b = jax.random.uniform(kb, (1, out_dim), jnp.float32, -bound, bound)
    return w, b


def reference_forward(x, params):
    """Pure-JAX reference with the same dtype policy as the kernel
    (bf16 matmul inputs, f32 accumulation, f32 bias add)."""
    h = x
    n = len(params)
    for i, (w, b) in enumerate(params):
        h = jnp.dot(h.astype(jnp.bfloat16), w.astype(jnp.bfloat16),
                    preferred_element_type=jnp.float32) + b
        if i < n - 1:
            h = jnp.maximum(h, 0.0)
    return h


if __name__ == "__main__":
    # Shapes consistent with the module: input_dim=32, hidden=(100,)*4,
    # output_dim=16; batch=512 gives grid=(1,) on v5e/v6e, grid=(2,) on v7x.
    batch, input_dim, output_dim = 512, 32, 16
    hidden_dim = (100, 100, 100, 100)

    key = jax.random.PRNGKey(0)
    key_x, *layer_keys = jax.random.split(key, 6)

    dims = (input_dim,) + hidden_dim + (output_dim,)
    params = [init_linear_params(layer_keys[i], dims[i], dims[i + 1])
              for i in range(5)]

    # One-time parameter prep (hoisted out of the per-call path).
    prepared = prepare_params(params)

    x = jax.random.normal(key_x, (batch, input_dim), jnp.float32)
    ref = reference_forward(x, params)

    # Main path: batch divides the block evenly -> no wrapper copies at all.
    out = jax.block_until_ready(five_layer_net(x, prepared))
    assert out.shape == (batch, output_dim)
    assert jnp.allclose(out, ref, atol=1e-2, rtol=1e-2), (
        float(jnp.max(jnp.abs(out - ref))))

    # Ragged-tail path: multi-step grid with a padded remainder block.
    out_tail = jax.block_until_ready(
        five_layer_net(x[:500], prepared, block_rows=256))
    assert out_tail.shape == (500, output_dim)
    assert jnp.allclose(out_tail, ref[:500], atol=1e-2, rtol=1e-2), (
        float(jnp.max(jnp.abs(out_tail - ref[:500]))))

    print("KERNEL_OK")
</pallas_src>

<mosaic_0001>
module attributes {stable_mosaic.version = 11 : i64} {
  func.func @_mlp_kernel(%arg0: i32, %arg1: memref<512x32xf32, #tpu.memory_space<vmem>>, %arg2: memref<32x128xbf16, #tpu.memory_space<vmem>>, %arg3: memref<3x128x128xbf16, #tpu.memory_space<vmem>>, %arg4: memref<128x16xbf16, #tpu.memory_space<vmem>>, %arg5: memref<4x128xf32, #tpu.memory_space<vmem>>, %arg6: memref<1x16xf32, #tpu.memory_space<vmem>>, %arg7: memref<512x16xf32, #tpu.memory_space<vmem>>) attributes {dimension_semantics = [#tpu.dimension_semantics<parallel>], iteration_bounds = array<i64: 1>, scalar_prefetch = 0 : i64, scratch_operands = 0 : i64, tpu.core_type = #tpu.core_type<tc>, window_params = [{transform_indices = @transform_0, window_bounds = array<i64: 512, 32>}, {pipeline_mode = #tpu.pipeline_mode<synchronous>, transform_indices = @transform_1, window_bounds = array<i64: 32, 128>}, {pipeline_mode = #tpu.pipeline_mode<synchronous>, transform_indices = @transform_2, window_bounds = array<i64: 3, 128, 128>}, {pipeline_mode = #tpu.pipeline_mode<synchronous>, transform_indices = @transform_3, window_bounds = array<i64: 128, 16>}, {pipeline_mode = #tpu.pipeline_mode<synchronous>, transform_indices = @transform_4, window_bounds = array<i64: 4, 128>}, {pipeline_mode = #tpu.pipeline_mode<synchronous>, transform_indices = @transform_5, window_bounds = array<i64: 1, 16>}, {transform_indices = @transform_6, window_bounds = array<i64: 512, 16>}]} {
    %c0 = arith.constant 0 : index
    %c0_0 = arith.constant 0 : index
    %0 = vector.load %arg1[%c0, %c0_0] : memref<512x32xf32, #tpu.memory_space<vmem>>, vector<512x32xf32>
    %1 = arith.truncf %0 : vector<512x32xf32> to vector<512x32xbf16>
    %c0_1 = arith.constant 0 : index
    %c0_2 = arith.constant 0 : index
    %2 = vector.load %arg2[%c0_1, %c0_2] : memref<32x128xbf16, #tpu.memory_space<vmem>>, vector<32x128xbf16>
    %cst = arith.constant dense<0.000000e+00> : vector<512x128xf32>
    %3 = tpu.matmul %1, %2, %cst {dimension_numbers = #tpu.dot_dimension_numbers<[1], [0], [0], [1], [0, 0, 1, 1], [], []>} : vector<512x32xbf16>, vector<32x128xbf16>, vector<512x128xf32> -> vector<512x128xf32>
    %c0_3 = arith.constant 0 : index
    %c0_4 = arith.constant 0 : index
    %4 = vector.load %arg5[%c0_3, %c0_4] : memref<4x128xf32, #tpu.memory_space<vmem>>, vector<1x128xf32>
    %5 = vector.broadcast %4 : vector<1x128xf32> to vector<512x128xf32>
    %6 = arith.addf %3, %5 : vector<512x128xf32>
    %cst_5 = arith.constant 0.000000e+00 : f32
    %7 = vector.broadcast %cst_5 : f32 to vector<512x128xf32>
    %8 = arith.maximumf %6, %7 : vector<512x128xf32>
    %9 = arith.truncf %8 : vector<512x128xf32> to vector<512x128xbf16>
    %c0_6 = arith.constant 0 : index
    %c0_7 = arith.constant 0 : index
    %c0_8 = arith.constant 0 : index
    %10 = vector.load %arg3[%c0_6, %c0_7, %c0_8] : memref<3x128x128xbf16, #tpu.memory_space<vmem>>, vector<1x128x128xbf16>
    %11 = vector.shape_cast %10 : vector<1x128x128xbf16> to vector<128x128xbf16>
    %cst_9 = arith.constant dense<0.000000e+00> : vector<512x128xf32>
    %12 = tpu.matmul %9, %11, %cst_9 {dimension_numbers = #tpu.dot_dimension_numbers<[1], [0], [0], [1], [0, 0, 1, 1], [], []>} : vector<512x128xbf16>, vector<128x128xbf16>, vector<512x128xf32> -> vector<512x128xf32>
    %c1 = arith.constant 1 : index
    %c0_10 = arith.constant 0 : index
    %13 = vector.load %arg5[%c1, %c0_10] : memref<4x128xf32, #tpu.memory_space<vmem>>, vector<1x128xf32>
    %14 = vector.broadcast %13 : vector<1x128xf32> to vector<512x128xf32>
    %15 = arith.addf %12, %14 : vector<512x128xf32>
    %cst_11 = arith.constant 0.000000e+00 : f32
    %16 = vector.broadcast %cst_11 : f32 to vector<512x128xf32>
    %17 = arith.maximumf %15, %16 : vector<512x128xf32>
    %18 = arith.truncf %17 : vector<512x128xf32> to vector<512x128xbf16>
    %c1_12 = arith.constant 1 : index
    %c0_13 = arith.constant 0 : index
    %c0_14 = arith.constant 0 : index
    %19 = vector.load %arg3[%c1_12, %c0_13, %c0_14] : memref<3x128x128xbf16, #tpu.memory_space<vmem>>, vector<1x128x128xbf16>
    %20 = vector.shape_cast %19 : vector<1x128x128xbf16> to vector<128x128xbf16>
    %cst_15 = arith.constant dense<0.000000e+00> : vector<512x128xf32>
    %21 = tpu.matmul %18, %20, %cst_15 {dimension_numbers = #tpu.dot_dimension_numbers<[1], [0], [0], [1], [0, 0, 1, 1], [], []>} : vector<512x128xbf16>, vector<128x128xbf16>, vector<512x128xf32> -> vector<512x128xf32>
    %c2 = arith.constant 2 : index
    %c0_16 = arith.constant 0 : index
    %22 = vector.load %arg5[%c2, %c0_16] : memref<4x128xf32, #tpu.memory_space<vmem>>, vector<1x128xf32>
    %23 = vector.broadcast %22 : vector<1x128xf32> to vector<512x128xf32>
    %24 = arith.addf %21, %23 : vector<512x128xf32>
    %cst_17 = arith.constant 0.000000e+00 : f32
    %25 = vector.broadcast %cst_17 : f32 to vector<512x128xf32>
    %26 = arith.maximumf %24, %25 : vector<512x128xf32>
    %27 = arith.truncf %26 : vector<512x128xf32> to vector<512x128xbf16>
    %c2_18 = arith.constant 2 : index
    %c0_19 = arith.constant 0 : index
    %c0_20 = arith.constant 0 : index
    %28 = vector.load %arg3[%c2_18, %c0_19, %c0_20] : memref<3x128x128xbf16, #tpu.memory_space<vmem>>, vector<1x128x128xbf16>
    %29 = vector.shape_cast %28 : vector<1x128x128xbf16> to vector<128x128xbf16>
    %cst_21 = arith.constant dense<0.000000e+00> : vector<512x128xf32>
    %30 = tpu.matmul %27, %29, %cst_21 {dimension_numbers = #tpu.dot_dimension_numbers<[1], [0], [0], [1], [0, 0, 1, 1], [], []>} : vector<512x128xbf16>, vector<128x128xbf16>, vector<512x128xf32> -> vector<512x128xf32>
    %c3 = arith.constant 3 : index
    %c0_22 = arith.constant 0 : index
    %31 = vector.load %arg5[%c3, %c0_22] : memref<4x128xf32, #tpu.memory_space<vmem>>, vector<1x128xf32>
    %32 = vector.broadcast %31 : vector<1x128xf32> to vector<512x128xf32>
    %33 = arith.addf %30, %32 : vector<512x128xf32>
    %cst_23 = arith.constant 0.000000e+00 : f32
    %34 = vector.broadcast %cst_23 : f32 to vector<512x128xf32>
    %35 = arith.maximumf %33, %34 : vector<512x128xf32>
    %36 = arith.truncf %35 : vector<512x128xf32> to vector<512x128xbf16>
    %c0_24 = arith.constant 0 : index
    %c0_25 = arith.constant 0 : index
    %37 = vector.load %arg4[%c0_24, %c0_25] : memref<128x16xbf16, #tpu.memory_space<vmem>>, vector<128x16xbf16>
    %cst_26 = arith.constant dense<0.000000e+00> : vector<512x16xf32>
    %38 = tpu.matmul %36, %37, %cst_26 {dimension_numbers = #tpu.dot_dimension_numbers<[1], [0], [0], [1], [0, 0, 1, 1], [], []>} : vector<512x128xbf16>, vector<128x16xbf16>, vector<512x16xf32> -> vector<512x16xf32>
    %c0_27 = arith.constant 0 : index
    %c0_28 = arith.constant 0 : index
    %39 = vector.load %arg6[%c0_27, %c0_28] : memref<1x16xf32, #tpu.memory_space<vmem>>, vector<1x16xf32>
    %40 = vector.broadcast %39 : vector<1x16xf32> to vector<512x16xf32>
    %41 = arith.addf %38, %40 : vector<512x16xf32>
    %c0_29 = arith.constant 0 : index
    %c0_30 = arith.constant 0 : index
    %42 = vector.load %arg7[%c0_29, %c0_30] : memref<512x16xf32, #tpu.memory_space<vmem>>, vector<512x16xf32>
    tpu.vector_store %arg7[%c0_29, %c0_30], %41 {strides = array<i32>} : memref<512x16xf32, #tpu.memory_space<vmem>>, vector<512x16xf32>,
    return
  }
  func.func @transform_0(%arg0: i32) -> (i32, i32) {
    %c0_i32 = arith.constant 0 : i32
    %c0_i32_0 = arith.constant 0 : i32
    return %arg0, %c0_i32 : i32, i32
  }
  func.func @transform_1(%arg0: i32) -> (i32, i32) {
    %c0_i32 = arith.constant 0 : i32
    %c0_i32_0 = arith.constant 0 : i32
    %c0_i32_1 = arith.constant 0 : i32
    return %c0_i32, %c0_i32_0 : i32, i32
  }
  func.func @transform_2(%arg0: i32) -> (i32, i32, i32) {
    %c0_i32 = arith.constant 0 : i32
    %c0_i32_0 = arith.constant 0 : i32
    %c0_i32_1 = arith.constant 0 : i32
    %c0_i32_2 = arith.constant 0 : i32
    return %c0_i32, %c0_i32_0, %c0_i32_1 : i32, i32, i32
  }
  func.func @transform_3(%arg0: i32) -> (i32, i32) {
    %c0_i32 = arith.constant 0 : i32
    %c0_i32_0 = arith.constant 0 : i32
    %c0_i32_1 = arith.constant 0 : i32
    return %c0_i32, %c0_i32_0 : i32, i32
  }
  func.func @transform_4(%arg0: i32) -> (i32, i32) {
    %c0_i32 = arith.constant 0 : i32
    %c0_i32_0 = arith.constant 0 : i32
    %c0_i32_1 = arith.constant 0 : i32
    return %c0_i32, %c0_i32_0 : i32, i32
  }
  func.func @transform_5(%arg0: i32) -> (i32, i32) {
    %c0_i32 = arith.constant 0 : i32
    %c0_i32_0 = arith.constant 0 : i32
    %c0_i32_1 = arith.constant 0 : i32
    return %c0_i32, %c0_i32_0 : i32, i32
  }
  func.func @transform_6(%arg0: i32) -> (i32, i32) {
    %c0_i32 = arith.constant 0 : i32
    %c0_i32_0 = arith.constant 0 : i32
    return %arg0, %c0_i32 : i32, i32
  }
}

</mosaic_0001>

<bundles_post_ra>
// kernel: tpu_custom_call.1
= control target key start
LH: loop header
LB: loop body
LE: loop exit
PB: predicated region body
PF: predicated region fallthrough
CT: control target
= control target key end

     0   :  { %vm141_vm0 = vcmask 261120   ;;  %vm2347_vm1 = vcmask 130048   ;;  %s4134_s1 = inlined_call_operand.vmem [shape: bf16[32,128], index: 1, kind: input, shape index: {}]   ;;  %s4135_s0 = inlined_call_operand.vmem [shape: f32[512,32], index: 0, kind: input, shape index: {}]   ;;  %s4136_s2 = inlined_call_operand.vmem [shape: bf16[3,128,128], index: 2, kind: input, shape index: {}]   ;;  %s4137_s4 = inlined_call_operand.vmem [shape: f32[4,128], index: 4, kind: input, shape index: {}]   ;;  %s4138_s3 = inlined_call_operand.vmem [shape: bf16[128,16], index: 3, kind: input, shape index: {}]   ;;  %s4139_s5 = inlined_call_operand.vmem [shape: f32[1,16], index: 5, kind: input, shape index: {}]   ;;  %s4140_s6 = inlined_call_operand.vmem [shape: f32[512,16], index: 6, kind: output, shape index: {}]  }
   0x1   :  { %v3105_v0 = vld [vmem:[%s4134_s1] sm:$0xff]   ;;  %v3106_v1 = vld [vmem:[%s4134_s1 + $0x8] sm:$0xff]   ;;  %v26_v5 = vld [vmem:[%s4135_s0 + $0x10] sm:$0xff] }
   0x2   :  { %2713 = vmatprep.subr.bf16.mxu0 %v3105_v0  ;;  %v24_v2 = vld [vmem:[%s4135_s0] sm:$0xff]  ;;  %v25_v3 = vld [vmem:[%s4135_s0 + $0x8] sm:$0xff]  ;;  %3101 = vmatprep.subr.bf16.mxu1 %v3105_v0  ;;  %v27_v6 = vld [vmem:[%s4135_s0 + $0x18] sm:$0xff] }
   0x3   :  { %2714 = vmatpush3.bf16.msra.mxu0 %v3105_v0  ;;  %v88_v4 = vpack.c.bf16 %v25_v3, %v24_v2  ;;  %3103 = vmatpush3.bf16.msra.mxu1 %v3105_v0  ;;  %v28_v7 = vld [vmem:[%s4135_s0 + $0x20] sm:$0xff]  ;;  %v29_v8 = vld [vmem:[%s4135_s0 + $0x28] sm:$0xff]  ;;  %v89_v9 = vpack.c.bf16 %v27_v6, %v26_v5  ;;  %v30_v11 = vld [vmem:[%s4135_s0 + $0x30] sm:$0xff] }
   0x4   :  { %2715 = vmatprep.subr.bf16.mxu0 %v3106_v1  ;;  %3102 = vmatprep.subr.bf16.mxu1 %v3106_v1  ;;  %v90_v10 = vpack.c.bf16 %v29_v8, %v28_v7  ;;  %v31_v12 = vld [vmem:[%s4135_s0 + $0x38] sm:$0xff]  ;;  %v32_v13 = vld [vmem:[%s4135_s0 + $0x40] sm:$0xff]  ;;  %v33_v14 = vld [vmem:[%s4135_s0 + $0x48] sm:$0xff] }
   0x5   :  { %2717 = vmatprep.mubr.msk.bf16.mxu0 %vm141_vm0, %v88_v4  ;;  %v56_v15 = vld [vmem:[%s4135_s0 + $0x100] sm:$0xff]  ;;  %v57_v16 = vld [vmem:[%s4135_s0 + $0x108] sm:$0xff]  ;;  %v58_v17 = vld [vmem:[%s4135_s0 + $0x110] sm:$0xff]  ;;  %v91_v19 = vpack.c.bf16 %v31_v12, %v30_v11  ;;  %v92_v24 = vpack.c.bf16 %v33_v14, %v32_v13 }
   0x6   :  { %v59_v18 = vld [vmem:[%s4135_s0 + $0x118] sm:$0xff]  ;;  %v104_v20 = vpack.c.bf16 %v57_v16, %v56_v15  ;;  %v60_v22 = vld [vmem:[%s4135_s0 + $0x120] sm:$0xff]  ;;  %v61_v23 = vld [vmem:[%s4135_s0 + $0x128] sm:$0xff] }
   0x7   :  { %2716 = vmatpush3.bf16.msra.mxu0 %v3106_v1  ;;  %3104 = vmatpush3.bf16.msra.mxu1 %v3106_v1  ;;  %v105_v21 = vpack.c.bf16 %v59_v18, %v58_v17  ;;  %v106_v25 = vpack.c.bf16 %v61_v23, %v60_v22  ;;  %v34_v26 = vld [vmem:[%s4135_s0 + $0x50] sm:$0xff]  ;;  %v63_v28 = vld [vmem:[%s4135_s0 + $0x138] sm:$0xff]  ;;  %v64_v30 = vld [vmem:[%s4135_s0 + $0x140] sm:$0xff] }
   0x8   :  { %2749 = vmatprep.mubr.msk.bf16.mxu1 %vm141_vm0, %v104_v20  ;;  %v62_v27 = vld [vmem:[%s4135_s0 + $0x130] sm:$0xff]  ;;  %v35_v29 = vld [vmem:[%s4135_s0 + $0x58] sm:$0xff]  ;;  %v65_v31 = vld [vmem:[%s4135_s0 + $0x148] sm:$0xff] }
   0x9   :  { %v36_v32 = vld [vmem:[%s4135_s0 + $0x60] sm:$0xff]  ;;  %v37_v33 = vld [vmem:[%s4135_s0 + $0x68] sm:$0xff]  ;;  %v107_v34 = vpack.c.bf16 %v63_v28, %v62_v27  ;;  %v93_v35 = vpack.c.bf16 %v35_v29, %v34_v26  ;;  %v108_v36 = vpack.c.bf16 %v65_v31, %v64_v30  ;;  %v66_v38 = vld [vmem:[%s4135_s0 + $0x150] sm:$0xff] }
   0xa   :  { %2718 = vmatmul.mubr.msk.bf16.vlgmr.msra.gmra.mrb[0].mxu0 %vm141_vm0, %v89_v9  ;;  %2750 = vmatmul.mubr.msk.bf16.vlgmr.msra.gmra.mrb[0].mxu1 %vm141_vm0, %v105_v21  ;;  %v94_v37 = vpack.c.bf16 %v37_v33, %v36_v32  ;;  %v67_v39 = vld [vmem:[%s4135_s0 + $0x158] sm:$0xff]  ;;  %v3107_v40 = vld [vmem:[%s4136_s2] sm:$0xff]   ;;  %v38_v41 = vld [vmem:[%s4135_s0 + $0x70] sm:$0xff] }
   0xb   :  { %2721 = vmatprep.mubr.msk.bf16.mxu0 %vm141_vm0, %v90_v10  ;;  %2753 = vmatprep.mubr.msk.bf16.mxu1 %vm141_vm0, %v106_v25  ;;  %v39_v42 = vld [vmem:[%s4135_s0 + $0x78] sm:$0xff]  ;;  %v3108_v43 = vld [vmem:[%s4136_s2 + $0x8] sm:$0xff]   ;;  %v40_v44 = vld [vmem:[%s4135_s0 + $0x80] sm:$0xff]  ;;  %v109_v48 = vpack.c.bf16 %v67_v39, %v66_v38 }
   0xc   :  { %v68_v45 = vld [vmem:[%s4135_s0 + $0x160] sm:$0xff]  ;;  %v69_v46 = vld [vmem:[%s4135_s0 + $0x168] sm:$0xff]  ;;  %2781 = vmatprep.subr.bf16.mxu1 %v3107_v40  ;;  %v3109_v49 = vld [vmem:[%s4136_s2 + $0x10] sm:$0xff]   ;;  %v95_v50 = vpack.c.bf16 %v39_v42, %v38_v41 }
   0xd   :  { %v41_v47 = vld [vmem:[%s4135_s0 + $0x88] sm:$0xff]  ;;  %2782 = vmatpush3.bf16.msra.mxu1 %v3107_v40  ;;  %v110_v51 = vpack.c.bf16 %v69_v46, %v68_v45  ;;  %v3110_v53 = vld [vmem:[%s4136_s2 + $0x18] sm:$0xff]   ;;  %v70_v54 = vld [vmem:[%s4135_s0 + $0x170] sm:$0xff] }
   0xe   :  { %2783 = vmatprep.subr.bf16.mxu1 %v3108_v43  ;;  %v96_v52 = vpack.c.bf16 %v41_v47, %v40_v44  ;;  %v71_v55 = vld [vmem:[%s4135_s0 + $0x178] sm:$0xff]  ;;  %v42_v56 = vld [vmem:[%s4135_s0 + $0x90] sm:$0xff]  ;;  %v72_v58 = vld [vmem:[%s4135_s0 + $0x180] sm:$0xff] }
   0xf   :  { %v43_v57 = vld [vmem:[%s4135_s0 + $0x98] sm:$0xff]  ;;  %v73_v59 = vld [vmem:[%s4135_s0 + $0x188] sm:$0xff]  ;;  %v44_v60 = vld [vmem:[%s4135_s0 + $0xa0] sm:$0xff]  ;;  %v111_v63 = vpack.c.bf16 %v71_v55, %v70_v54 }
  0x10   :  { %v45_v61 = vld [vmem:[%s4135_s0 + $0xa8] sm:$0xff]  ;;  %v3111_v62 = vld [vmem:[%s4136_s2 + $0x20] sm:$0xff]   ;;  %v97_v0 = vpack.c.bf16 %v43_v57, %v42_v56  ;;  %v112_v1 = vpack.c.bf16 %v73_v59, %v72_v58  ;;  %v46_v4 = vld [vmem:[%s4135_s0 + $0xb0] sm:$0xff] }
  0x11   :  { %2784 = vmatpush3.bf16.msra.mxu1 %v3108_v43  ;;  %v98_v2 = vpack.c.bf16 %v45_v61, %v44_v60  ;;  %v3112_v3 = vld [vmem:[%s4136_s2 + $0x28] sm:$0xff]   ;;  %v74_v5 = vld [vmem:[%s4135_s0 + $0x190] sm:$0xff]  ;;  %v75_v6 = vld [vmem:[%s4135_s0 + $0x198] sm:$0xff] }
  0x12   :  { %2722 = vmatmul.mubr.msk.bf16.gmra.mrb[4].mxu0 %vm141_vm0, %v91_v19  ;;  %2754 = vmatmul.mubr.msk.bf16.gmra.mrb[4].mxu1 %vm141_vm0, %v107_v34  ;;  %v47_v7 = vld [vmem:[%s4135_s0 + $0xb8] sm:$0xff]  ;;  %v76_v8 = vld [vmem:[%s4135_s0 + $0x1a0] sm:$0xff]  ;;  %v77_v9 = vld [vmem:[%s4135_s0 + $0x1a8] sm:$0xff]  ;;  %v113_v12 = vpack.c.bf16 %v75_v6, %v74_v5 }
  0x13   :  { %2725 = vmatprep.mubr.msk.bf16.mxu0 %vm141_vm0, %v92_v24  ;;  %2757 = vmatprep.mubr.msk.bf16.mxu1 %vm141_vm0, %v108_v36  ;;  %v48_v10 = vld [vmem:[%s4135_s0 + $0xc0] sm:$0xff]  ;;  %v49_v11 = vld [vmem:[%s4135_s0 + $0xc8] sm:$0xff]  ;;  %v3113_v13 = vld [vmem:[%s4136_s2 + $0x30] sm:$0xff]   ;;  %v99_v14 = vpack.c.bf16 %v47_v7, %v46_v4  ;;  %v114_v15 = vpack.c.bf16 %v77_v9, %v76_v8 }
  0x14   :  { %2785 = vmatprep.subr.bf16.mxu1 %v3109_v49  ;;  %v100_v16 = vpack.c.bf16 %v49_v11, %v48_v10  ;;  %v50_v17 = vld [vmem:[%s4135_s0 + $0xd0] sm:$0xff]  ;;  %v79_v19 = vld [vmem:[%s4135_s0 + $0x1b8] sm:$0xff]  ;;  %v80_v21 = vld [vmem:[%s4135_s0 + $0x1c0] sm:$0xff] }
  0x15   :  { %2786 = vmatpush3.bf16.msra.mxu1 %v3109_v49  ;;  %v78_v18 = vld [vmem:[%s4135_s0 + $0x1b0] sm:$0xff]  ;;  %v51_v20 = vld [vmem:[%s4135_s0 + $0xd8] sm:$0xff]  ;;  %v81_v22 = vld [vmem:[%s4135_s0 + $0x1c8] sm:$0xff] }
  0x16   :  { %2787 = vmatprep.subr.bf16.mxu1 %v3110_v53  ;;  %v52_v23 = vld [vmem:[%s4135_s0 + $0xe0] sm:$0xff]  ;;  %v53_v24 = vld [vmem:[%s4135_s0 + $0xe8] sm:$0xff]  ;;  %v115_v25 = vpack.c.bf16 %v79_v19, %v78_v18  ;;  %v101_v26 = vpack.c.bf16 %v51_v20, %v50_v17  ;;  %v116_v27 = vpack.c.bf16 %v81_v22, %v80_v21  ;;  %v54_v29 = vld [vmem:[%s4135_s0 + $0xf0] sm:$0xff] }
  0x17   :  { %v102_v28 = vpack.c.bf16 %v53_v24, %v52_v23  ;;  %v82_v30 = vld [vmem:[%s4135_s0 + $0x1d0] sm:$0xff]  ;;  %v83_v31 = vld [vmem:[%s4135_s0 + $0x1d8] sm:$0xff]  ;;  %v84_v33 = vld [vmem:[%s4135_s0 + $0x1e0] sm:$0xff] }
  0x18   :  { %v55_v32 = vld [vmem:[%s4135_s0 + $0xf8] sm:$0xff]  ;;  %v85_v34 = vld [vmem:[%s4135_s0 + $0x1e8] sm:$0xff]  ;;  %v86_v38 = vld [vmem:[%s4135_s0 + $0x1f0] sm:$0xff] }
  0x19   :  { %2788 = vmatpush3.bf16.msra.mxu1 %v3110_v53  ;;  %v103_v36 = vpack.c.bf16 %v55_v32, %v54_v29  ;;  %v87_v39 = vld [vmem:[%s4135_s0 + $0x1f8] sm:$0xff]  ;;  %v3431_v42 = vld [vmem:[%s4137_s4] ss:$0 sm:$0xff]  ;;  %v3117_v59 = vld [vmem:[%s4136_s2 + $0x50] sm:$0xff]  }
  0x1a   :  { %2726 = vmatmul.mubr.msk.bf16.gmra.mrb[8].mxu0 %vm141_vm0, %v93_v35  ;;  %2758 = vmatmul.mubr.msk.bf16.gmra.mrb[8].mxu1 %vm141_vm0, %v109_v48  ;;  %v117_v35 = vpack.c.bf16 %v83_v31, %v82_v30  ;;  %v119_v40 = vpack.c.bf16 %v87_v39, %v86_v38  ;;  %v3114_v41 = vld [vmem:[%s4136_s2 + $0x38] sm:$0xff]  }
  0x1b   :  { %2729 = vmatprep.mubr.msk.bf16.mxu0 %vm141_vm0, %v94_v37  ;;  %2761 = vmatprep.mubr.msk.bf16.mxu1 %vm141_vm0, %v110_v51  ;;  %v118_v37 = vpack.c.bf16 %v85_v34, %v84_v33  ;;  %v3116_v51 = vld [vmem:[%s4136_s2 + $0x48] sm:$0xff]  }
  0x1c   :  { %2789 = vmatprep.subr.bf16.mxu1 %v3111_v62 }
  0x1d   :  { %2790 = vmatpush3.bf16.msra.mxu1 %v3111_v62 }
  0x1e   :  { %2791 = vmatprep.subr.bf16.mxu1 %v3112_v3 }
  0x21   :  { %2792 = vmatpush3.bf16.msra.mxu1 %v3112_v3 }
  0x22   :  { %2730 = vmatmul.mubr.msk.bf16.gmra.mrb[12].mxu0 %vm141_vm0, %v95_v50  ;;  %2762 = vmatmul.mubr.msk.bf16.gmra.mrb[12].mxu1 %vm141_vm0, %v111_v63  ;;  %v3115_v50 = vld [vmem:[%s4136_s2 + $0x40] sm:$0xff]  }
  0x23   :  { %2733 = vmatprep.mubr.msk.bf16.mxu0 %vm141_vm0, %v96_v52  ;;  %2765 = vmatprep.mubr.msk.bf16.mxu1 %vm141_vm0, %v112_v1 }
  0x24   :  { %2793 = vmatprep.subr.bf16.mxu1 %v3113_v13  ;;  %2861 = vmatprep.subr.bf16.mxu0 %v3115_v50 }
  0x25   :  { %2794 = vmatpush3.bf16.msra.mxu1 %v3113_v13  ;;  %2862 = vmatpush3.bf16.msra.mxu0 %v3115_v50  ;;  %v3118_v13 = vld [vmem:[%s4136_s2 + $0x58] sm:$0xff]  }
  0x26   :  { %2795 = vmatprep.subr.bf16.mxu1 %v3114_v41  ;;  %2863 = vmatprep.subr.bf16.mxu0 %v3116_v51 }
  0x29   :  { %2796 = vmatpush3.bf16.msra.mxu1 %v3114_v41  ;;  %2864 = vmatpush3.bf16.msra.mxu0 %v3116_v51 }
  0x2a   :  { %2734 = vmatmul.mubr.msk.bf16.gmra.mrb[16].mxu0 %vm141_vm0, %v97_v0  ;;  %2766 = vmatmul.mubr.msk.bf16.gmra.mrb[16].mxu1 %vm141_vm0, %v113_v12 }
  0x2b   :  { %2737 = vmatprep.mubr.msk.bf16.mxu0 %vm141_vm0, %v98_v2  ;;  %2769 = vmatprep.mubr.msk.bf16.mxu1 %vm141_vm0, %v114_v15 }
  0x2c   :  { %2865 = vmatprep.subr.bf16.mxu0 %v3117_v59 }
  0x2d   :  { %2866 = vmatpush3.bf16.msra.mxu0 %v3117_v59 }
  0x2e   :  { %2867 = vmatprep.subr.bf16.mxu0 %v3118_v13 }
  0x31   :  { %2868 = vmatpush3.bf16.msra.mxu0 %v3118_v13 }
  0x32   :  { %2738 = vmatmul.mubr.msk.bf16.gmra.mrb[20].mxu0 %vm141_vm0, %v99_v14  ;;  %2770 = vmatmul.mubr.msk.bf16.gmra.mrb[20].mxu1 %vm141_vm0, %v115_v25  ;;  %v3119_v25 = vld [vmem:[%s4136_s2 + $0x60] sm:$0xff]  }
  0x33   :  { %2741 = vmatprep.mubr.msk.bf16.mxu0 %vm141_vm0, %v100_v16  ;;  %2773 = vmatprep.mubr.msk.bf16.mxu1 %vm141_vm0, %v116_v27 }
  0x34   :  { %2869 = vmatprep.subr.bf16.mxu0 %v3119_v25 }
  0x35   :  { %2870 = vmatpush3.bf16.msra.mxu0 %v3119_v25 }
  0x3a   :  { %2742 = vmatmul.mubr.msk.bf16.gmra.mrb[24].mxu0 %vm141_vm0, %v101_v26  ;;  %2774 = vmatmul.mubr.msk.bf16.gmra.mrb[24].mxu1 %vm141_vm0, %v117_v35 }
  0x3b   :  { %2745 = vmatprep.mubr.msk.bf16.mxu0 %vm141_vm0, %v102_v28  ;;  %2777 = vmatprep.mubr.msk.bf16.mxu1 %vm141_vm0, %v118_v37 }
  0x42   :  { %2746 = vmatmul.mubr.msk.bf16.gmra.mrb[28].mxu0 %vm141_vm0, %v103_v36  ;;  %2778 = vmatmul.mubr.msk.bf16.gmra.mrb[28].mxu1 %vm141_vm0, %v119_v40 }
  0xdd   :  { %v2719_v43 = vpop.f32.mrb[0].mxu0  ;;  %v2751_v58 = vpop.f32.mrb[0].mxu1 }
  0xde   :  { %v281_v44 = vadd.f32 %v2719_v43, %v3431_v42  ;;  %v272_v45 = vpop.f32.mrb[1].mxu0  ;;  %v409_v62 = vadd.f32 %v2751_v58, %v3431_v42  ;;  %v400_v63 = vpop.f32.mrb[1].mxu1 }
  0xdf   :  { %v273_v46 = vadd.f32 %v3431_v42, %v272_v45  ;;  %v2720_v47 = vpop.f32.mrb[2].mxu0  ;;  %v401_v2 = vadd.f32 %v3431_v42, %v400_v63  ;;  %v2752_v3 = vpop.f32.mrb[2].mxu1 }
  0xe0   :  { %v284_v48 = vadd.f32 %v2720_v47, %v3431_v42  ;;  %v275_v49 = vpop.f32.mrb[3].mxu0  ;;  %v529_v53 = vmax.f32 %v281_v44, 0.0  ;;  %v561_v6 = vmax.f32 %v409_v62, 0.0  ;;  %v412_v7 = vadd.f32 %v2752_v3, %v3431_v42  ;;  %v403_v8 = vpop.f32.mrb[3].mxu1  ;;  %v3120_v44 = vld [vmem:[%s4136_s2 + $0x68] sm:$0xff]  }
  0xe1   :  { %v276_v52 = vadd.f32 %v3431_v42, %v275_v49  ;;  %v527_v55 = vmax.f32 %v273_v46, 0.0  ;;  %v559_v11 = vmax.f32 %v401_v2, 0.0  ;;  %v404_v12 = vadd.f32 %v3431_v42, %v403_v8  ;;  %2871 = vmatprep.subr.bf16.mxu0 %v3120_v44 }
  0xe2   :  { %v530_v54 = vmax.f32 %v284_v48, 0.0  ;;  %v562_v15 = vmax.f32 %v412_v7, 0.0  ;;  %2872 = vmatpush3.bf16.msra.mxu0 %v3120_v44 }
  0xe3   :  { %v528_v56 = vmax.f32 %v276_v52, 0.0  ;;  %v560_v18 = vmax.f32 %v404_v12, 0.0 }
  0xe4   :  { %v592_v57 = vpack.c.bf16 %v530_v54, %v529_v53  ;;  %v3457_v21 = vpack.c.bf16 %v562_v15, %v561_v6 }
  0xe5   :  { %v591_v60 = vpack.c.bf16 %v528_v56, %v527_v55  ;;  %v2723_v61 = vpop.f32.mrb[4].mxu0  ;;  %v3459_v23 = vpack.c.bf16 %v560_v18, %v559_v11  ;;  %v2755_v24 = vpop.f32.mrb[4].mxu1  ;;  %v3121_v56 = vld [vmem:[%s4136_s2 + $0x70] sm:$0xff]  }
  0xe6   :  { %v297_v0 = vadd.f32 %v2723_v61, %v3431_v42  ;;  %v288_v1 = vpop.f32.mrb[5].mxu0  ;;  %v425_v28 = vadd.f32 %v2755_v24, %v3431_v42  ;;  %v416_v29 = vpop.f32.mrb[5].mxu1  ;;  %2873 = vmatprep.subr.bf16.mxu0 %v3121_v56 }
  0xe7   :  { %v289_v4 = vadd.f32 %v3431_v42, %v288_v1  ;;  %v2724_v5 = vpop.f32.mrb[6].mxu0  ;;  %2797 = vmatprep.mubr.bf16.mxu1 %v591_v60  ;;  %v417_v32 = vadd.f32 %v3431_v42, %v416_v29  ;;  %v2756_v33 = vpop.f32.mrb[6].mxu1  ;;  %2874 = vmatpush3.bf16.msra.mxu0 %v3121_v56 }
  0xe8   :  { %v300_v9 = vadd.f32 %v2724_v5, %v3431_v42  ;;  %v291_v10 = vpop.f32.mrb[7].mxu0  ;;  %2798 = vmatmul.mubr.bf16.vlgmr.msra.gmra.mrb[32].mxu1 %v592_v57  ;;  %v533_v16 = vmax.f32 %v297_v0, 0.0  ;;  %v565_v36 = vmax.f32 %v425_v28, 0.0  ;;  %v428_v37 = vadd.f32 %v2756_v33, %v3431_v42  ;;  %v419_v38 = vpop.f32.mrb[7].mxu1 }
  0xe9   :  { %v292_v14 = vadd.f32 %v3431_v42, %v291_v10  ;;  %v531_v19 = vmax.f32 %v289_v4, 0.0  ;;  %v563_v41 = vmax.f32 %v417_v32, 0.0  ;;  %v420_v43 = vadd.f32 %v3431_v42, %v419_v38 }
  0xea   :  { %v534_v17 = vmax.f32 %v300_v9, 0.0  ;;  %v566_v46 = vmax.f32 %v428_v37, 0.0 }
  0xeb   :  { %v532_v20 = vmax.f32 %v292_v14, 0.0  ;;  %v564_v49 = vmax.f32 %v420_v43, 0.0 }
  0xec   :  { %v594_v22 = vpack.c.bf16 %v534_v17, %v533_v16  ;;  %v3475_v52 = vpack.c.bf16 %v566_v46, %v565_v36 }
  0xed   :  { %v593_v26 = vpack.c.bf16 %v532_v20, %v531_v19  ;;  %v2727_v27 = vpop.f32.mrb[8].mxu0  ;;  %v3477_v54 = vpack.c.bf16 %v564_v49, %v563_v41  ;;  %v2759_v55 = vpop.f32.mrb[8].mxu1 }
  0xee   :  { %v313_v30 = vadd.f32 %v2727_v27, %v3431_v42  ;;  %v304_v31 = vpop.f32.mrb[9].mxu0  ;;  %v441_v59 = vadd.f32 %v2759_v55, %v3431_v42  ;;  %v432_v60 = vpop.f32.mrb[9].mxu1 }
  0xef   :  { %v305_v34 = vadd.f32 %v3431_v42, %v304_v31  ;;  %v2728_v35 = vpop.f32.mrb[10].mxu0  ;;  %2801 = vmatprep.mubr.bf16.mxu1 %v593_v26  ;;  %v433_v63 = vadd.f32 %v3431_v42, %v432_v60  ;;  %v2760_v0 = vpop.f32.mrb[10].mxu1 }
  0xf0   :  { %v316_v39 = vadd.f32 %v2728_v35, %v3431_v42  ;;  %v307_v40 = vpop.f32.mrb[11].mxu0  ;;  %2802 = vmatmul.mubr.bf16.gmra.mrb[36].mxu1 %v594_v22  ;;  %v537_v47 = vmax.f32 %v313_v30, 0.0  ;;  %v569_v3 = vmax.f32 %v441_v59, 0.0  ;;  %v444_v4 = vadd.f32 %v2760_v0, %v3431_v42  ;;  %v435_v5 = vpop.f32.mrb[11].mxu1 }
  0xf1   :  { %v308_v45 = vadd.f32 %v3431_v42, %v307_v40  ;;  %v535_v50 = vmax.f32 %v305_v34, 0.0  ;;  %v567_v8 = vmax.f32 %v433_v63, 0.0  ;;  %v436_v9 = vadd.f32 %v3431_v42, %v435_v5 }
  0xf2   :  { %v538_v48 = vmax.f32 %v316_v39, 0.0  ;;  %v570_v11 = vmax.f32 %v444_v4, 0.0 }
  0xf3   :  { %v536_v51 = vmax.f32 %v308_v45, 0.0  ;;  %v568_v14 = vmax.f32 %v436_v9, 0.0 }
  0xf4   :  { %v596_v53 = vpack.c.bf16 %v538_v48, %v537_v47  ;;  %v3490_v17 = vpack.c.bf16 %v570_v11, %v569_v3 }
  0xf5   :  { %v595_v57 = vpack.c.bf16 %v536_v51, %v535_v50  ;;  %v2731_v58 = vpop.f32.mrb[12].mxu0  ;;  %v3492_v19 = vpack.c.bf16 %v568_v14, %v567_v8  ;;  %v2763_v20 = vpop.f32.mrb[12].mxu1 }
  0xf6   :  { %v329_v61 = vadd.f32 %v2731_v58, %v3431_v42  ;;  %v320_v62 = vpop.f32.mrb[13].mxu0  ;;  %v457_v25 = vadd.f32 %v2763_v20, %v3431_v42  ;;  %v448_v26 = vpop.f32.mrb[13].mxu1 }
  0xf7   :  { %v321_v1 = vadd.f32 %v3431_v42, %v320_v62  ;;  %v2732_v2 = vpop.f32.mrb[14].mxu0  ;;  %2805 = vmatprep.mubr.bf16.mxu1 %v595_v57  ;;  %v449_v29 = vadd.f32 %v3431_v42, %v448_v26  ;;  %v2764_v30 = vpop.f32.mrb[14].mxu1 }
  0xf8   :  { %v332_v6 = vadd.f32 %v2732_v2, %v3431_v42  ;;  %v323_v7 = vpop.f32.mrb[15].mxu0  ;;  %2806 = vmatmul.mubr.bf16.gmra.mrb[40].mxu1 %v596_v53  ;;  %v541_v12 = vmax.f32 %v329_v61, 0.0  ;;  %v573_v33 = vmax.f32 %v457_v25, 0.0  ;;  %v460_v34 = vadd.f32 %v2764_v30, %v3431_v42  ;;  %v451_v35 = vpop.f32.mrb[15].mxu1 }
  0xf9   :  { %v324_v10 = vadd.f32 %v3431_v42, %v323_v7  ;;  %v539_v15 = vmax.f32 %v321_v1, 0.0  ;;  %v571_v38 = vmax.f32 %v449_v29, 0.0  ;;  %v452_v39 = vadd.f32 %v3431_v42, %v451_v35 }
  0xfa   :  { %v542_v13 = vmax.f32 %v332_v6, 0.0  ;;  %v574_v41 = vmax.f32 %v460_v34, 0.0 }
  0xfb   :  { %v540_v16 = vmax.f32 %v324_v10, 0.0  ;;  %v572_v45 = vmax.f32 %v452_v39, 0.0 }
  0xfc   :  { %v598_v18 = vpack.c.bf16 %v542_v13, %v541_v12  ;;  %v3502_v48 = vpack.c.bf16 %v574_v41, %v573_v33 }
  0xfd   :  { %v597_v22 = vpack.c.bf16 %v540_v16, %v539_v15  ;;  %v2735_v24 = vpop.f32.mrb[16].mxu0  ;;  %v3504_v50 = vpack.c.bf16 %v572_v45, %v571_v38  ;;  %v2767_v51 = vpop.f32.mrb[16].mxu1 }
  0xfe   :  { %v345_v27 = vadd.f32 %v2735_v24, %v3431_v42  ;;  %v336_v28 = vpop.f32.mrb[17].mxu0  ;;  %v473_v56 = vadd.f32 %v2767_v51, %v3431_v42  ;;  %v464_v57 = vpop.f32.mrb[17].mxu1 }
  0xff   :  { %v337_v31 = vadd.f32 %v3431_v42, %v336_v28  ;;  %v2736_v32 = vpop.f32.mrb[18].mxu0  ;;  %2809 = vmatprep.mubr.bf16.mxu1 %v597_v22  ;;  %v465_v60 = vadd.f32 %v3431_v42, %v464_v57  ;;  %v2768_v61 = vpop.f32.mrb[18].mxu1 }
 0x100   :  { %v348_v36 = vadd.f32 %v2736_v32, %v3431_v42  ;;  %v339_v37 = vpop.f32.mrb[19].mxu0  ;;  %2810 = vmatmul.mubr.bf16.gmra.mrb[44].mxu1 %v598_v18  ;;  %v545_v43 = vmax.f32 %v345_v27, 0.0  ;;  %v577_v0 = vmax.f32 %v473_v56, 0.0  ;;  %v476_v1 = vadd.f32 %v2768_v61, %v3431_v42  ;;  %v467_v2 = vpop.f32.mrb[19].mxu1 }
 0x101   :  { %v340_v40 = vadd.f32 %v3431_v42, %v339_v37  ;;  %v543_v46 = vmax.f32 %v337_v31, 0.0  ;;  %v575_v5 = vmax.f32 %v465_v60, 0.0  ;;  %v468_v6 = vadd.f32 %v3431_v42, %v467_v2 }
 0x102   :  { %v546_v44 = vmax.f32 %v348_v36, 0.0  ;;  %v578_v8 = vmax.f32 %v476_v1, 0.0 }
 0x103   :  { %v544_v47 = vmax.f32 %v340_v40, 0.0  ;;  %v576_v11 = vmax.f32 %v468_v6, 0.0 }
 0x104   :  { %v600_v49 = vpack.c.bf16 %v546_v44, %v545_v43  ;;  %v3514_v14 = vpack.c.bf16 %v578_v8, %v577_v0 }
 0x105   :  { %v599_v53 = vpack.c.bf16 %v544_v47, %v543_v46  ;;  %v2739_v55 = vpop.f32.mrb[20].mxu0  ;;  %v3516_v16 = vpack.c.bf16 %v576_v11, %v575_v5  ;;  %v2771_v18 = vpop.f32.mrb[20].mxu1 }
 0x106   :  { %v361_v58 = vadd.f32 %v2739_v55, %v3431_v42  ;;  %v352_v59 = vpop.f32.mrb[21].mxu0  ;;  %v489_v24 = vadd.f32 %v2771_v18, %v3431_v42  ;;  %v480_v25 = vpop.f32.mrb[21].mxu1 }
 0x107   :  { %v353_v62 = vadd.f32 %v3431_v42, %v352_v59  ;;  %v2740_v63 = vpop.f32.mrb[22].mxu0  ;;  %2813 = vmatprep.mubr.bf16.mxu1 %v599_v53  ;;  %v481_v28 = vadd.f32 %v3431_v42, %v480_v25  ;;  %v2772_v29 = vpop.f32.mrb[22].mxu1 }
 0x108   :  { %v364_v3 = vadd.f32 %v2740_v63, %v3431_v42  ;;  %v355_v4 = vpop.f32.mrb[23].mxu0  ;;  %2814 = vmatmul.mubr.bf16.gmra.mrb[48].mxu1 %v600_v49  ;;  %v549_v9 = vmax.f32 %v361_v58, 0.0  ;;  %v581_v32 = vmax.f32 %v489_v24, 0.0  ;;  %v492_v33 = vadd.f32 %v2772_v29, %v3431_v42  ;;  %v483_v34 = vpop.f32.mrb[23].mxu1 }
 0x109   :  { %v356_v7 = vadd.f32 %v3431_v42, %v355_v4  ;;  %v547_v12 = vmax.f32 %v353_v62, 0.0  ;;  %v579_v37 = vmax.f32 %v481_v28, 0.0  ;;  %v484_v38 = vadd.f32 %v3431_v42, %v483_v34 }
 0x10a   :  { %v550_v10 = vmax.f32 %v364_v3, 0.0  ;;  %v582_v40 = vmax.f32 %v492_v33, 0.0 }
 0x10b   :  { %v548_v13 = vmax.f32 %v356_v7, 0.0  ;;  %v580_v44 = vmax.f32 %v484_v38, 0.0 }
 0x10c   :  { %v602_v15 = vpack.c.bf16 %v550_v10, %v549_v9  ;;  %v3526_v47 = vpack.c.bf16 %v582_v40, %v581_v32  ;;  %v3126_v40 = vld [vmem:[%s4136_s2 + $0x98] sm:$0xff]  }
 0x10d   :  { %v601_v20 = vpack.c.bf16 %v548_v13, %v547_v12  ;;  %v2743_v22 = vpop.f32.mrb[24].mxu0  ;;  %v617_v51 = vpack.c.bf16 %v580_v44, %v579_v37  ;;  %v2775_v53 = vpop.f32.mrb[24].mxu1 }
 0x10e   :  { %v377_v26 = vadd.f32 %v2743_v22, %v3431_v42  ;;  %v368_v27 = vpop.f32.mrb[25].mxu0  ;;  %v505_v57 = vadd.f32 %v2775_v53, %v3431_v42  ;;  %v496_v58 = vpop.f32.mrb[25].mxu1 }
 0x10f   :  { %v369_v30 = vadd.f32 %v3431_v42, %v368_v27  ;;  %v2744_v31 = vpop.f32.mrb[26].mxu0  ;;  %2817 = vmatprep.mubr.bf16.mxu1 %v601_v20  ;;  %v497_v61 = vadd.f32 %v3431_v42, %v496_v58  ;;  %v2776_v62 = vpop.f32.mrb[26].mxu1 }
 0x110   :  { %v380_v35 = vadd.f32 %v2744_v31, %v3431_v42  ;;  %v371_v36 = vpop.f32.mrb[27].mxu0  ;;  %2818 = vmatmul.mubr.bf16.gmra.mrb[52].mxu1 %v602_v15  ;;  %v553_v41 = vmax.f32 %v377_v26, 0.0  ;;  %v585_v1 = vmax.f32 %v505_v57, 0.0  ;;  %v508_v2 = vadd.f32 %v2776_v62, %v3431_v42  ;;  %v499_v3 = vpop.f32.mrb[27].mxu1 }
 0x111   :  { %v372_v39 = vadd.f32 %v3431_v42, %v371_v36  ;;  %v551_v45 = vmax.f32 %v369_v30, 0.0  ;;  %v583_v6 = vmax.f32 %v497_v61, 0.0  ;;  %v500_v7 = vadd.f32 %v3431_v42, %v499_v3  ;;  %v3128_v61 = vld [vmem:[%s4136_s2 + $0xa8] sm:$0xff]  }
 0x112   :  { %v554_v43 = vmax.f32 %v380_v35, 0.0  ;;  %v586_v9 = vmax.f32 %v508_v2, 0.0 }
 0x113   :  { %v552_v46 = vmax.f32 %v372_v39, 0.0  ;;  %v584_v12 = vmax.f32 %v500_v7, 0.0  ;;  %v3125_v39 = vld [vmem:[%s4136_s2 + $0x90] sm:$0xff]  }
 0x114   :  { %v604_v49 = vpack.c.bf16 %v554_v43, %v553_v41  ;;  %v620_v18 = vpack.c.bf16 %v586_v9, %v585_v1 }
 0x115   :  { %v603_v55 = vpack.c.bf16 %v552_v46, %v551_v45  ;;  %v2747_v56 = vpop.f32.mrb[28].mxu0  ;;  %v619_v22 = vpack.c.bf16 %v584_v12, %v583_v6  ;;  %v2779_v24 = vpop.f32.mrb[28].mxu1 }
 0x116   :  { %v393_v59 = vadd.f32 %v2747_v56, %v3431_v42  ;;  %v384_v60 = vpop.f32.mrb[29].mxu0  ;;  %v521_v26 = vadd.f32 %v2779_v24, %v3431_v42  ;;  %v512_v27 = vpop.f32.mrb[29].mxu1 }
 0x117   :  { %v385_v63 = vadd.f32 %v3431_v42, %v384_v60  ;;  %v2748_v0 = vpop.f32.mrb[30].mxu0  ;;  %2821 = vmatprep.mubr.bf16.mxu1 %v603_v55  ;;  %v513_v28 = vadd.f32 %v3431_v42, %v512_v27  ;;  %v2780_v29 = vpop.f32.mrb[30].mxu1 }
 0x118   :  { %v396_v4 = vadd.f32 %v2748_v0, %v3431_v42  ;;  %v387_v5 = vpop.f32.mrb[31].mxu0  ;;  %2822 = vmatmul.mubr.bf16.gmra.mrb[56].mxu1 %v604_v49  ;;  %v557_v10 = vmax.f32 %v393_v59, 0.0  ;;  %v589_v30 = vmax.f32 %v521_v26, 0.0  ;;  %v524_v31 = vadd.f32 %v2780_v29, %v3431_v42  ;;  %v515_v32 = vpop.f32.mrb[31].mxu1  ;;  %v3127_v49 = vld [vmem:[%s4136_s2 + $0xa0] sm:$0xff]  }
 0x119   :  { %v388_v8 = vadd.f32 %v3431_v42, %v387_v5  ;;  %v555_v13 = vmax.f32 %v385_v63, 0.0  ;;  %v587_v33 = vmax.f32 %v513_v28, 0.0  ;;  %v516_v34 = vadd.f32 %v3431_v42, %v515_v32  ;;  %v3122_v42 = vld [vmem:[%s4136_s2 + $0x78] sm:$0xff]  }
 0x11a   :  { %v558_v11 = vmax.f32 %v396_v4, 0.0  ;;  %v590_v35 = vmax.f32 %v524_v31, 0.0  ;;  %2875 = vmatprep.subr.bf16.mxu0 %v3122_v42  ;;  %v3129_v4 = vld [vmem:[%s4136_s2 + $0xb0] sm:$0xff]  }
 0x11b   :  { %v556_v15 = vmax.f32 %v388_v8, 0.0  ;;  %v588_v36 = vmax.f32 %v516_v34, 0.0  ;;  %2876 = vmatpush3.bf16.msra.mxu0 %v3122_v42 }
 0x11c   :  { %v606_v20 = vpack.c.bf16 %v558_v11, %v557_v10  ;;  %v622_v37 = vpack.c.bf16 %v590_v35, %v589_v30 }
 0x11d   :  { %v605_v25 = vpack.c.bf16 %v556_v15, %v555_v13  ;;  %v621_v38 = vpack.c.bf16 %v588_v36, %v587_v33  ;;  %v3130_v13 = vld [vmem:[%s4136_s2 + $0xb8] sm:$0xff]  }
 0x11f   :  { %2825 = vmatprep.mubr.bf16.mxu1 %v605_v25 }
 0x120   :  { %2826 = vmatmul.mubr.bf16.gmra.mrb[60].mxu1 %v606_v20 }
 0x121   :  { %2829 = vmatprep.mubr.bf16.mxu1 %v3459_v23  ;;  %v3124_v23 = vld [vmem:[%s4136_s2 + $0x88] sm:$0xff]  }
 0x128   :  { %2830 = vmatmul.mubr.bf16.gmra.mrb[64].mxu1 %v3457_v21  ;;  %v3123_v21 = vld [vmem:[%s4136_s2 + $0x80] sm:$0xff]  }
 0x129   :  { %2833 = vmatprep.mubr.bf16.mxu1 %v3477_v54  ;;  %2941 = vmatprep.subr.bf16.mxu1 %v3123_v21 }
 0x12a   :  { %2942 = vmatpush3.bf16.msra.mxu1 %v3123_v21 }
 0x12b   :  { %2943 = vmatprep.subr.bf16.mxu1 %v3124_v23 }
 0x12e   :  { %2944 = vmatpush3.bf16.msra.mxu1 %v3124_v23 }
 0x12f   :  { %2945 = vmatprep.subr.bf16.mxu1 %v3125_v39 }
 0x130   :  { %2834 = vmatmul.mubr.bf16.gmra.mrb[68].mxu1 %v3475_v52  ;;  %v3563_v52 = vld [vmem:[%s4137_s4 + $0x1] ss:$0 sm:$0xff] }
 0x131   :  { %2837 = vmatprep.mubr.bf16.mxu1 %v3492_v19 }
 0x132   :  { %2946 = vmatpush3.bf16.msra.mxu1 %v3125_v39 }
 0x133   :  { %2947 = vmatprep.subr.bf16.mxu1 %v3126_v40 }
 0x136   :  { %2948 = vmatpush3.bf16.msra.mxu1 %v3126_v40 }
 0x137   :  { %2949 = vmatprep.subr.bf16.mxu1 %v3127_v49 }
 0x138   :  { %2838 = vmatmul.mubr.bf16.gmra.mrb[72].mxu1 %v3490_v17 }
 0x139   :  { %2841 = vmatprep.mubr.bf16.mxu1 %v3504_v50 }
 0x13a   :  { %2950 = vmatpush3.bf16.msra.mxu1 %v3127_v49 }
 0x13b   :  { %2951 = vmatprep.subr.bf16.mxu1 %v3128_v61 }
 0x13e   :  { %2952 = vmatpush3.bf16.msra.mxu1 %v3128_v61 }
 0x13f   :  { %2953 = vmatprep.subr.bf16.mxu1 %v3129_v4 }
 0x140   :  { %2842 = vmatmul.mubr.bf16.gmra.mrb[76].mxu1 %v3502_v48 }
 0x141   :  { %2845 = vmatprep.mubr.bf16.mxu1 %v3516_v16 }
 0x142   :  { %2954 = vmatpush3.bf16.msra.mxu1 %v3129_v4 }
 0x143   :  { %2955 = vmatprep.subr.bf16.mxu1 %v3130_v13 }
 0x146   :  { %2956 = vmatpush3.bf16.msra.mxu1 %v3130_v13 }
 0x148   :  { %2846 = vmatmul.mubr.bf16.gmra.mrb[80].mxu1 %v3514_v14 }
 0x149   :  { %2849 = vmatprep.mubr.bf16.mxu1 %v617_v51 }
 0x150   :  { %2850 = vmatmul.mubr.bf16.gmra.mrb[84].mxu1 %v3526_v47 }
 0x151   :  { %2853 = vmatprep.mubr.bf16.mxu1 %v619_v22 }
 0x158   :  { %2854 = vmatmul.mubr.bf16.gmra.mrb[88].mxu1 %v620_v18 }
 0x159   :  { %2857 = vmatprep.mubr.bf16.mxu1 %v621_v38 }
 0x160   :  { %2858 = vmatmul.mubr.bf16.gmra.mrb[92].mxu1 %v622_v37 }
 0x1bb   :  { %v2799_v54 = vpop.f32.mrb[32].mxu1 }
 0x1bc   :  { %v735_v17 = vadd.f32 %v2799_v54, %v3563_v52  ;;  %v726_v19 = vpop.f32.mrb[33].mxu1 }
 0x1bd   :  { %v727_v48 = vadd.f32 %v3563_v52, %v726_v19  ;;  %v2800_v50 = vpop.f32.mrb[34].mxu1 }
 0x1be   :  { %v738_v14 = vadd.f32 %v2800_v50, %v3563_v52  ;;  %v729_v16 = vpop.f32.mrb[35].mxu1  ;;  %v983_v43 = vmax.f32 %v735_v17, 0.0 }
 0x1bf   :  { %v730_v41 = vadd.f32 %v3563_v52, %v729_v16  ;;  %v981_v45 = vmax.f32 %v727_v48, 0.0 }
 0x1c0   :  { %v984_v44 = vmax.f32 %v738_v14, 0.0 }
 0x1c1   :  { %v982_v46 = vmax.f32 %v730_v41, 0.0 }
 0x1c2   :  { %v1046_v47 = vpack.c.bf16 %v984_v44, %v983_v43 }
 0x1c3   :  { %v1045_v51 = vpack.c.bf16 %v982_v46, %v981_v45  ;;  %v2803_v53 = vpop.f32.mrb[36].mxu1 }
 0x1c4   :  { %v751_v55 = vadd.f32 %v2803_v53, %v3563_v52  ;;  %v742_v56 = vpop.f32.mrb[37].mxu1 }
 0x1c5   :  { %v743_v57 = vadd.f32 %v3563_v52, %v742_v56  ;;  %v2804_v58 = vpop.f32.mrb[38].mxu1  ;;  %2877 = vmatprep.mubr.bf16.mxu0 %v1045_v51 }
 0x1c6   :  { %v754_v59 = vadd.f32 %v2804_v58, %v3563_v52  ;;  %v745_v60 = vpop.f32.mrb[39].mxu1  ;;  %2878 = vmatmul.mubr.bf16.vlgmr.msra.gmra.mrb[32].mxu0 %v1046_v47  ;;  %v987_v63 = vmax.f32 %v751_v55, 0.0 }
 0x1c7   :  { %v746_v62 = vadd.f32 %v3563_v52, %v745_v60  ;;  %v985_v1 = vmax.f32 %v743_v57, 0.0 }
 0x1c8   :  { %v988_v0 = vmax.f32 %v754_v59, 0.0 }
 0x1c9   :  { %v986_v2 = vmax.f32 %v746_v62, 0.0 }
 0x1ca   :  { %v1048_v3 = vpack.c.bf16 %v988_v0, %v987_v63 }
 0x1cb   :  { %v1047_v5 = vpack.c.bf16 %v986_v2, %v985_v1  ;;  %v2807_v6 = vpop.f32.mrb[40].mxu1 }
 0x1cc   :  { %v767_v7 = vadd.f32 %v2807_v6, %v3563_v52  ;;  %v758_v8 = vpop.f32.mrb[41].mxu1 }
 0x1cd   :  { %v759_v9 = vadd.f32 %v3563_v52, %v758_v8  ;;  %v2808_v10 = vpop.f32.mrb[42].mxu1  ;;  %2881 = vmatprep.mubr.bf16.mxu0 %v1047_v5 }
 0x1ce   :  { %v770_v11 = vadd.f32 %v2808_v10, %v3563_v52  ;;  %v761_v12 = vpop.f32.mrb[43].mxu1  ;;  %2882 = vmatmul.mubr.bf16.gmra.mrb[36].mxu0 %v1048_v3  ;;  %v991_v18 = vmax.f32 %v767_v7, 0.0 }
 0x1cf   :  { %v762_v15 = vadd.f32 %v3563_v52, %v761_v12  ;;  %v989_v22 = vmax.f32 %v759_v9, 0.0 }
 0x1d0   :  { %v992_v20 = vmax.f32 %v770_v11, 0.0 }
 0x1d1   :  { %v990_v24 = vmax.f32 %v762_v15, 0.0 }
 0x1d2   :  { %v1050_v25 = vpack.c.bf16 %v992_v20, %v991_v18 }
 0x1d3   :  { %v1049_v26 = vpack.c.bf16 %v990_v24, %v989_v22  ;;  %v2811_v27 = vpop.f32.mrb[44].mxu1 }
 0x1d4   :  { %v783_v28 = vadd.f32 %v2811_v27, %v3563_v52  ;;  %v774_v29 = vpop.f32.mrb[45].mxu1 }
 0x1d5   :  { %v775_v30 = vadd.f32 %v3563_v52, %v774_v29  ;;  %v2812_v31 = vpop.f32.mrb[46].mxu1  ;;  %2885 = vmatprep.mubr.bf16.mxu0 %v1049_v26 }
 0x1d6   :  { %v786_v32 = vadd.f32 %v2812_v31, %v3563_v52  ;;  %v777_v33 = vpop.f32.mrb[47].mxu1  ;;  %2886 = vmatmul.mubr.bf16.gmra.mrb[40].mxu0 %v1050_v25  ;;  %v995_v35 = vmax.f32 %v783_v28, 0.0 }
 0x1d7   :  { %v778_v34 = vadd.f32 %v3563_v52, %v777_v33  ;;  %v993_v37 = vmax.f32 %v775_v30, 0.0 }
 0x1d8   :  { %v996_v36 = vmax.f32 %v786_v32, 0.0 }
 0x1d9   :  { %v994_v38 = vmax.f32 %v778_v34, 0.0 }
 0x1da   :  { %v1052_v42 = vpack.c.bf16 %v996_v36, %v995_v35 }
 0x1db   :  { %v1051_v21 = vpack.c.bf16 %v994_v38, %v993_v37  ;;  %v2815_v23 = vpop.f32.mrb[48].mxu1 }
 0x1dc   :  { %v799_v54 = vadd.f32 %v2815_v23, %v3563_v52  ;;  %v790_v17 = vpop.f32.mrb[49].mxu1 }
 0x1dd   :  { %v791_v19 = vadd.f32 %v3563_v52, %v790_v17  ;;  %v2816_v48 = vpop.f32.mrb[50].mxu1  ;;  %2889 = vmatprep.mubr.bf16.mxu0 %v1051_v21 }
 0x1de   :  { %v802_v50 = vadd.f32 %v2816_v48, %v3563_v52  ;;  %v793_v14 = vpop.f32.mrb[51].mxu1  ;;  %2890 = vmatmul.mubr.bf16.gmra.mrb[44].mxu0 %v1052_v42  ;;  %v999_v39 = vmax.f32 %v799_v54, 0.0 }
 0x1df   :  { %v794_v16 = vadd.f32 %v3563_v52, %v793_v14  ;;  %v997_v41 = vmax.f32 %v791_v19, 0.0 }
 0x1e0   :  { %v1000_v40 = vmax.f32 %v802_v50, 0.0 }
 0x1e1   :  { %v998_v43 = vmax.f32 %v794_v16, 0.0 }
 0x1e2   :  { %v1054_v44 = vpack.c.bf16 %v1000_v40, %v999_v39 }
 0x1e3   :  { %v1053_v45 = vpack.c.bf16 %v998_v43, %v997_v41  ;;  %v2819_v46 = vpop.f32.mrb[52].mxu1 }
 0x1e4   :  { %v815_v47 = vadd.f32 %v2819_v46, %v3563_v52  ;;  %v806_v49 = vpop.f32.mrb[53].mxu1 }
 0x1e5   :  { %v807_v51 = vadd.f32 %v3563_v52, %v806_v49  ;;  %v2820_v53 = vpop.f32.mrb[54].mxu1  ;;  %2893 = vmatprep.mubr.bf16.mxu0 %v1053_v45 }
 0x1e6   :  { %v818_v55 = vadd.f32 %v2820_v53, %v3563_v52  ;;  %v809_v56 = vpop.f32.mrb[55].mxu1  ;;  %2894 = vmatmul.mubr.bf16.gmra.mrb[48].mxu0 %v1054_v44  ;;  %v1003_v58 = vmax.f32 %v815_v47, 0.0 }
 0x1e7   :  { %v810_v57 = vadd.f32 %v3563_v52, %v809_v56  ;;  %v1001_v60 = vmax.f32 %v807_v51, 0.0 }
 0x1e8   :  { %v1004_v59 = vmax.f32 %v818_v55, 0.0 }
 0x1e9   :  { %v1002_v61 = vmax.f32 %v810_v57, 0.0 }
 0x1ea   :  { %v1056_v62 = vpack.c.bf16 %v1004_v59, %v1003_v58 }
 0x1eb   :  { %v1055_v63 = vpack.c.bf16 %v1002_v61, %v1001_v60  ;;  %v2823_v0 = vpop.f32.mrb[56].mxu1 }
 0x1ec   :  { %v831_v1 = vadd.f32 %v2823_v0, %v3563_v52  ;;  %v822_v2 = vpop.f32.mrb[57].mxu1 }
 0x1ed   :  { %v823_v3 = vadd.f32 %v3563_v52, %v822_v2  ;;  %v2824_v4 = vpop.f32.mrb[58].mxu1  ;;  %2897 = vmatprep.mubr.bf16.mxu0 %v1055_v63 }
 0x1ee   :  { %v834_v5 = vadd.f32 %v2824_v4, %v3563_v52  ;;  %v825_v6 = vpop.f32.mrb[59].mxu1  ;;  %2898 = vmatmul.mubr.bf16.gmra.mrb[52].mxu0 %v1056_v62  ;;  %v1007_v8 = vmax.f32 %v831_v1, 0.0 }
 0x1ef   :  { %v826_v7 = vadd.f32 %v3563_v52, %v825_v6  ;;  %v1005_v10 = vmax.f32 %v823_v3, 0.0 }
 0x1f0   :  { %v1008_v9 = vmax.f32 %v834_v5, 0.0 }
 0x1f1   :  { %v1006_v11 = vmax.f32 %v826_v7, 0.0 }
 0x1f2   :  { %v1058_v12 = vpack.c.bf16 %v1008_v9, %v1007_v8 }
 0x1f3   :  { %v1057_v13 = vpack.c.bf16 %v1006_v11, %v1005_v10  ;;  %v2827_v15 = vpop.f32.mrb[60].mxu1 }
 0x1f4   :  { %v847_v18 = vadd.f32 %v2827_v15, %v3563_v52  ;;  %v838_v20 = vpop.f32.mrb[61].mxu1 }
 0x1f5   :  { %v839_v22 = vadd.f32 %v3563_v52, %v838_v20  ;;  %v2828_v24 = vpop.f32.mrb[62].mxu1  ;;  %2901 = vmatprep.mubr.bf16.mxu0 %v1057_v13 }
 0x1f6   :  { %v850_v25 = vadd.f32 %v2828_v24, %v3563_v52  ;;  %v841_v26 = vpop.f32.mrb[63].mxu1  ;;  %2902 = vmatmul.mubr.bf16.gmra.mrb[56].mxu0 %v1058_v12  ;;  %v1011_v28 = vmax.f32 %v847_v18, 0.0 }
 0x1f7   :  { %v842_v27 = vadd.f32 %v3563_v52, %v841_v26  ;;  %v1009_v30 = vmax.f32 %v839_v22, 0.0 }
 0x1f8   :  { %v1012_v29 = vmax.f32 %v850_v25, 0.0 }
 0x1f9   :  { %v1010_v31 = vmax.f32 %v842_v27, 0.0 }
 0x1fa   :  { %v1060_v32 = vpack.c.bf16 %v1012_v29, %v1011_v28 }
 0x1fb   :  { %v1059_v33 = vpack.c.bf16 %v1010_v31, %v1009_v30  ;;  %v2831_v34 = vpop.f32.mrb[64].mxu1 }
 0x1fc   :  { %v863_v35 = vadd.f32 %v2831_v34, %v3563_v52  ;;  %v854_v36 = vpop.f32.mrb[65].mxu1 }
 0x1fd   :  { %v855_v37 = vadd.f32 %v3563_v52, %v854_v36  ;;  %v2832_v38 = vpop.f32.mrb[66].mxu1  ;;  %2905 = vmatprep.mubr.bf16.mxu0 %v1059_v33 }
 0x1fe   :  { %v866_v42 = vadd.f32 %v2832_v38, %v3563_v52  ;;  %v857_v21 = vpop.f32.mrb[67].mxu1  ;;  %2906 = vmatmul.mubr.bf16.gmra.mrb[60].mxu0 %v1060_v32  ;;  %v1015_v54 = vmax.f32 %v863_v35, 0.0 }
 0x1ff   :  { %v858_v23 = vadd.f32 %v3563_v52, %v857_v21  ;;  %v1013_v19 = vmax.f32 %v855_v37, 0.0 }
 0x200   :  { %v1016_v17 = vmax.f32 %v866_v42, 0.0 }
 0x201   :  { %v1014_v48 = vmax.f32 %v858_v23, 0.0 }
 0x202   :  { %v1062_v50 = vpack.c.bf16 %v1016_v17, %v1015_v54 }
 0x203   :  { %v1061_v14 = vpack.c.bf16 %v1014_v48, %v1013_v19  ;;  %v2835_v16 = vpop.f32.mrb[68].mxu1 }
 0x204   :  { %v879_v39 = vadd.f32 %v2835_v16, %v3563_v52  ;;  %v870_v40 = vpop.f32.mrb[69].mxu1 }
 0x205   :  { %v871_v41 = vadd.f32 %v3563_v52, %v870_v40  ;;  %v2836_v43 = vpop.f32.mrb[70].mxu1  ;;  %2909 = vmatprep.mubr.bf16.mxu0 %v1061_v14 }
 0x206   :  { %v882_v44 = vadd.f32 %v2836_v43, %v3563_v52  ;;  %v873_v45 = vpop.f32.mrb[71].mxu1  ;;  %2910 = vmatmul.mubr.bf16.gmra.mrb[64].mxu0 %v1062_v50  ;;  %v1019_v47 = vmax.f32 %v879_v39, 0.0 }
 0x207   :  { %v874_v46 = vadd.f32 %v3563_v52, %v873_v45  ;;  %v1017_v51 = vmax.f32 %v871_v41, 0.0 }
 0x208   :  { %v1020_v49 = vmax.f32 %v882_v44, 0.0 }
 0x209   :  { %v1018_v53 = vmax.f32 %v874_v46, 0.0 }
 0x20a   :  { %v1064_v55 = vpack.c.bf16 %v1020_v49, %v1019_v47 }
 0x20b   :  { %v1063_v56 = vpack.c.bf16 %v1018_v53, %v1017_v51  ;;  %v2839_v57 = vpop.f32.mrb[72].mxu1 }
 0x20c   :  { %v895_v58 = vadd.f32 %v2839_v57, %v3563_v52  ;;  %v886_v59 = vpop.f32.mrb[73].mxu1 }
 0x20d   :  { %v887_v60 = vadd.f32 %v3563_v52, %v886_v59  ;;  %v2840_v61 = vpop.f32.mrb[74].mxu1  ;;  %2913 = vmatprep.mubr.bf16.mxu0 %v1063_v56 }
 0x20e   :  { %v898_v62 = vadd.f32 %v2840_v61, %v3563_v52  ;;  %v889_v63 = vpop.f32.mrb[75].mxu1  ;;  %2914 = vmatmul.mubr.bf16.gmra.mrb[68].mxu0 %v1064_v55  ;;  %v1023_v1 = vmax.f32 %v895_v58, 0.0 }
 0x20f   :  { %v890_v0 = vadd.f32 %v3563_v52, %v889_v63  ;;  %v1021_v3 = vmax.f32 %v887_v60, 0.0 }
 0x210   :  { %v1024_v2 = vmax.f32 %v898_v62, 0.0 }
 0x211   :  { %v1022_v4 = vmax.f32 %v890_v0, 0.0 }
 0x212   :  { %v1066_v5 = vpack.c.bf16 %v1024_v2, %v1023_v1 }
 0x213   :  { %v1065_v6 = vpack.c.bf16 %v1022_v4, %v1021_v3  ;;  %v2843_v7 = vpop.f32.mrb[76].mxu1 }
 0x214   :  { %v911_v8 = vadd.f32 %v2843_v7, %v3563_v52  ;;  %v902_v9 = vpop.f32.mrb[77].mxu1 }
 0x215   :  { %v903_v10 = vadd.f32 %v3563_v52, %v902_v9  ;;  %v2844_v11 = vpop.f32.mrb[78].mxu1  ;;  %2917 = vmatprep.mubr.bf16.mxu0 %v1065_v6 }
 0x216   :  { %v914_v12 = vadd.f32 %v2844_v11, %v3563_v52  ;;  %v905_v13 = vpop.f32.mrb[79].mxu1  ;;  %2918 = vmatmul.mubr.bf16.gmra.mrb[72].mxu0 %v1066_v5  ;;  %v1027_v18 = vmax.f32 %v911_v8, 0.0 }
 0x217   :  { %v906_v15 = vadd.f32 %v3563_v52, %v905_v13  ;;  %v1025_v22 = vmax.f32 %v903_v10, 0.0 }
 0x218   :  { %v1028_v20 = vmax.f32 %v914_v12, 0.0 }
 0x219   :  { %v1026_v24 = vmax.f32 %v906_v15, 0.0  ;;  %v3131_v15 = vld [vmem:[%s4138_s3] sm:$0xff]  }
 0x21a   :  { %v1068_v25 = vpack.c.bf16 %v1028_v20, %v1027_v18  ;;  %3021 = vmatprep.subr.bf16.mxu0 %v3131_v15  ;;  %v3132_v18 = vld [vmem:[%s4138_s3 + $0x8] sm:$0xff]  }
 0x21b   :  { %v1067_v26 = vpack.c.bf16 %v1026_v24, %v1025_v22  ;;  %v2847_v27 = vpop.f32.mrb[80].mxu1  ;;  %3022 = vmatpush3.bf16.msra.mxu0 %v3131_v15 }
 0x21c   :  { %v927_v28 = vadd.f32 %v2847_v27, %v3563_v52  ;;  %v918_v29 = vpop.f32.mrb[81].mxu1  ;;  %3023 = vmatprep.subr.bf16.mxu0 %v3132_v18 }
 0x21d   :  { %v919_v30 = vadd.f32 %v3563_v52, %v918_v29  ;;  %v2848_v31 = vpop.f32.mrb[82].mxu1  ;;  %2921 = vmatprep.mubr.bf16.mxu0 %v1067_v26  ;;  %v3133_v29 = vld [vmem:[%s4138_s3 + $0x10] sm:$0xff]  }
 0x21e   :  { %v930_v32 = vadd.f32 %v2848_v31, %v3563_v52  ;;  %v921_v33 = vpop.f32.mrb[83].mxu1  ;;  %2922 = vmatmul.mubr.bf16.gmra.mrb[76].mxu0 %v1068_v25  ;;  %v1031_v35 = vmax.f32 %v927_v28, 0.0 }
 0x21f   :  { %v922_v34 = vadd.f32 %v3563_v52, %v921_v33  ;;  %v1029_v37 = vmax.f32 %v919_v30, 0.0  ;;  %3024 = vmatpush3.bf16.msra.mxu0 %v3132_v18  ;;  %v3134_v30 = vld [vmem:[%s4138_s3 + $0x18] sm:$0xff]  }
 0x220   :  { %v1032_v36 = vmax.f32 %v930_v32, 0.0  ;;  %3025 = vmatprep.subr.bf16.mxu0 %v3133_v29 }
 0x221   :  { %v1030_v38 = vmax.f32 %v922_v34, 0.0 }
 0x222   :  { %v1070_v42 = vpack.c.bf16 %v1032_v36, %v1031_v35 }
 0x223   :  { %v1069_v21 = vpack.c.bf16 %v1030_v38, %v1029_v37  ;;  %v2851_v23 = vpop.f32.mrb[84].mxu1  ;;  %3026 = vmatpush3.bf16.msra.mxu0 %v3133_v29  ;;  %v3135_v37 = vld [vmem:[%s4138_s3 + $0x20] sm:$0xff]  }
 0x224   :  { %v943_v54 = vadd.f32 %v2851_v23, %v3563_v52  ;;  %v934_v17 = vpop.f32.mrb[85].mxu1  ;;  %3027 = vmatprep.subr.bf16.mxu0 %v3134_v30 }
 0x225   :  { %v935_v19 = vadd.f32 %v3563_v52, %v934_v17  ;;  %v2852_v48 = vpop.f32.mrb[86].mxu1  ;;  %2925 = vmatprep.mubr.bf16.mxu0 %v1069_v21 }
 0x226   :  { %v946_v50 = vadd.f32 %v2852_v48, %v3563_v52  ;;  %v937_v14 = vpop.f32.mrb[87].mxu1  ;;  %2926 = vmatmul.mubr.bf16.gmra.mrb[80].mxu0 %v1070_v42  ;;  %v1035_v39 = vmax.f32 %v943_v54, 0.0 }
 0x227   :  { %v938_v16 = vadd.f32 %v3563_v52, %v937_v14  ;;  %v1033_v41 = vmax.f32 %v935_v19, 0.0  ;;  %3028 = vmatpush3.bf16.msra.mxu0 %v3134_v30 }
 0x228   :  { %v1036_v40 = vmax.f32 %v946_v50, 0.0  ;;  %3029 = vmatprep.subr.bf16.mxu0 %v3135_v37  ;;  %v3136_v50 = vld [vmem:[%s4138_s3 + $0x28] sm:$0xff]  }
 0x229   :  { %v1034_v43 = vmax.f32 %v938_v16, 0.0 }
 0x22a   :  { %v1072_v44 = vpack.c.bf16 %v1036_v40, %v1035_v39 }
 0x22b   :  { %v1071_v45 = vpack.c.bf16 %v1034_v43, %v1033_v41  ;;  %v2855_v46 = vpop.f32.mrb[88].mxu1  ;;  %3030 = vmatpush3.bf16.msra.mxu0 %v3135_v37 }
 0x22c   :  { %v959_v47 = vadd.f32 %v2855_v46, %v3563_v52  ;;  %v950_v49 = vpop.f32.mrb[89].mxu1  ;;  %3031 = vmatprep.subr.bf16.mxu0 %v3136_v50 }
 0x22d   :  { %v951_v51 = vadd.f32 %v3563_v52, %v950_v49  ;;  %v2856_v53 = vpop.f32.mrb[90].mxu1  ;;  %2929 = vmatprep.mubr.bf16.mxu0 %v1071_v45 }
 0x22e   :  { %v962_v55 = vadd.f32 %v2856_v53, %v3563_v52  ;;  %v953_v56 = vpop.f32.mrb[91].mxu1  ;;  %2930 = vmatmul.mubr.bf16.gmra.mrb[84].mxu0 %v1072_v44  ;;  %v1039_v58 = vmax.f32 %v959_v47, 0.0  ;;  %v3137_v44 = vld [vmem:[%s4138_s3 + $0x30] sm:$0xff]  }
 0x22f   :  { %v954_v57 = vadd.f32 %v3563_v52, %v953_v56  ;;  %v1037_v60 = vmax.f32 %v951_v51, 0.0  ;;  %3032 = vmatpush3.bf16.msra.mxu0 %v3136_v50 }
 0x230   :  { %v1040_v59 = vmax.f32 %v962_v55, 0.0  ;;  %3033 = vmatprep.subr.bf16.mxu0 %v3137_v44 }
 0x231   :  { %v1038_v61 = vmax.f32 %v954_v57, 0.0  ;;  %v3138_v57 = vld [vmem:[%s4138_s3 + $0x38] sm:$0xff]  }
 0x232   :  { %v1074_v62 = vpack.c.bf16 %v1040_v59, %v1039_v58 }
 0x233   :  { %v1073_v63 = vpack.c.bf16 %v1038_v61, %v1037_v60  ;;  %v2859_v0 = vpop.f32.mrb[92].mxu1  ;;  %3034 = vmatpush3.bf16.msra.mxu0 %v3137_v44 }
 0x234   :  { %v975_v1 = vadd.f32 %v2859_v0, %v3563_v52  ;;  %v966_v2 = vpop.f32.mrb[93].mxu1  ;;  %3035 = vmatprep.subr.bf16.mxu0 %v3138_v57 }
 0x235   :  { %v967_v3 = vadd.f32 %v3563_v52, %v966_v2  ;;  %v2860_v4 = vpop.f32.mrb[94].mxu1  ;;  %2933 = vmatprep.mubr.bf16.mxu0 %v1073_v63 }
 0x236   :  { %v978_v5 = vadd.f32 %v2860_v4, %v3563_v52  ;;  %v969_v6 = vpop.f32.mrb[95].mxu1  ;;  %2934 = vmatmul.mubr.bf16.gmra.mrb[88].mxu0 %v1074_v62  ;;  %v1043_v8 = vmax.f32 %v975_v1, 0.0 }
 0x237   :  { %v970_v7 = vadd.f32 %v3563_v52, %v969_v6  ;;  %v1041_v10 = vmax.f32 %v967_v3, 0.0  ;;  %v3656_v52 = vld [vmem:[%s4137_s4 + $0x2] ss:$0 sm:$0xff]  ;;  %3036 = vmatpush3.bf16.msra.mxu0 %v3138_v57 }
 0x238   :  { %v1044_v9 = vmax.f32 %v978_v5, 0.0 }
 0x239   :  { %v1042_v11 = vmax.f32 %v970_v7, 0.0 }
 0x23a   :  { %v1076_v12 = vpack.c.bf16 %v1044_v9, %v1043_v8 }
 0x23b   :  { %v1075_v13 = vpack.c.bf16 %v1042_v11, %v1041_v10 }
 0x23d   :  { %2937 = vmatprep.mubr.bf16.mxu0 %v1075_v13 }
 0x23e   :  { %2938 = vmatmul.mubr.bf16.gmra.mrb[92].mxu0 %v1076_v12 }
 0x299   :  { %v2879_v20 = vpop.f32.mrb[32].mxu0 }
 0x29a   :  { %v1190_v22 = vadd.f32 %v2879_v20, %v3656_v52  ;;  %v1181_v24 = vpop.f32.mrb[33].mxu0 }
 0x29b   :  { %v1182_v25 = vadd.f32 %v3656_v52, %v1181_v24  ;;  %v2880_v26 = vpop.f32.mrb[34].mxu0 }
 0x29c   :  { %v1193_v27 = vadd.f32 %v2880_v26, %v3656_v52  ;;  %v1184_v28 = vpop.f32.mrb[35].mxu0  ;;  %v1438_v32 = vmax.f32 %v1190_v22, 0.0 }
 0x29d   :  { %v1185_v31 = vadd.f32 %v3656_v52, %v1184_v28  ;;  %v1436_v34 = vmax.f32 %v1182_v25, 0.0 }
 0x29e   :  { %v1439_v33 = vmax.f32 %v1193_v27, 0.0 }
 0x29f   :  { %v1437_v35 = vmax.f32 %v1185_v31, 0.0 }
 0x2a0   :  { %v1501_v36 = vpack.c.bf16 %v1439_v33, %v1438_v32 }
 0x2a1   :  { %v1500_v38 = vpack.c.bf16 %v1437_v35, %v1436_v34  ;;  %v2883_v42 = vpop.f32.mrb[36].mxu0 }
 0x2a2   :  { %v1206_v21 = vadd.f32 %v2883_v42, %v3656_v52  ;;  %v1197_v23 = vpop.f32.mrb[37].mxu0 }
 0x2a3   :  { %v1198_v54 = vadd.f32 %v3656_v52, %v1197_v23  ;;  %v2884_v17 = vpop.f32.mrb[38].mxu0  ;;  %2957 = vmatprep.mubr.bf16.mxu1 %v1500_v38 }
 0x2a4   :  { %v1209_v19 = vadd.f32 %v2884_v17, %v3656_v52  ;;  %v1200_v48 = vpop.f32.mrb[39].mxu0  ;;  %2958 = vmatmul.mubr.bf16.vlgmr.msra.gmra.mrb[96].mxu1 %v1501_v36  ;;  %v1442_v16 = vmax.f32 %v1206_v21, 0.0 }
 0x2a5   :  { %v1201_v14 = vadd.f32 %v3656_v52, %v1200_v48  ;;  %v1440_v40 = vmax.f32 %v1198_v54, 0.0 }
 0x2a6   :  { %v1443_v39 = vmax.f32 %v1209_v19, 0.0 }
 0x2a7   :  { %v1441_v41 = vmax.f32 %v1201_v14, 0.0 }
 0x2a8   :  { %v1503_v43 = vpack.c.bf16 %v1443_v39, %v1442_v16 }
 0x2a9   :  { %v1502_v45 = vpack.c.bf16 %v1441_v41, %v1440_v40  ;;  %v2887_v46 = vpop.f32.mrb[40].mxu0 }
 0x2aa   :  { %v1222_v47 = vadd.f32 %v2887_v46, %v3656_v52  ;;  %v1213_v49 = vpop.f32.mrb[41].mxu0 }
 0x2ab   :  { %v1214_v51 = vadd.f32 %v3656_v52, %v1213_v49  ;;  %v2888_v53 = vpop.f32.mrb[42].mxu0  ;;  %2961 = vmatprep.mubr.bf16.mxu1 %v1502_v45 }
 0x2ac   :  { %v1225_v55 = vadd.f32 %v2888_v53, %v3656_v52  ;;  %v1216_v56 = vpop.f32.mrb[43].mxu0  ;;  %2962 = vmatmul.mubr.bf16.gmra.mrb[100].mxu1 %v1503_v43  ;;  %v1446_v59 = vmax.f32 %v1222_v47, 0.0 }
 0x2ad   :  { %v1217_v58 = vadd.f32 %v3656_v52, %v1216_v56  ;;  %v1444_v61 = vmax.f32 %v1214_v51, 0.0 }
 0x2ae   :  { %v1447_v60 = vmax.f32 %v1225_v55, 0.0 }
 0x2af   :  { %v1445_v62 = vmax.f32 %v1217_v58, 0.0 }
 0x2b0   :  { %v1505_v63 = vpack.c.bf16 %v1447_v60, %v1446_v59 }
 0x2b1   :  { %v1504_v0 = vpack.c.bf16 %v1445_v62, %v1444_v61  ;;  %v2891_v1 = vpop.f32.mrb[44].mxu0 }
 0x2b2   :  { %v1238_v2 = vadd.f32 %v2891_v1, %v3656_v52  ;;  %v1229_v3 = vpop.f32.mrb[45].mxu0 }
 0x2b3   :  { %v1230_v4 = vadd.f32 %v3656_v52, %v1229_v3  ;;  %v2892_v5 = vpop.f32.mrb[46].mxu0  ;;  %2965 = vmatprep.mubr.bf16.mxu1 %v1504_v0 }
 0x2b4   :  { %v1241_v6 = vadd.f32 %v2892_v5, %v3656_v52  ;;  %v1232_v7 = vpop.f32.mrb[47].mxu0  ;;  %2966 = vmatmul.mubr.bf16.gmra.mrb[104].mxu1 %v1505_v63  ;;  %v1450_v9 = vmax.f32 %v1238_v2, 0.0 }
 0x2b5   :  { %v1233_v8 = vadd.f32 %v3656_v52, %v1232_v7  ;;  %v1448_v11 = vmax.f32 %v1230_v4, 0.0 }
 0x2b6   :  { %v1451_v10 = vmax.f32 %v1241_v6, 0.0 }
 0x2b7   :  { %v1449_v12 = vmax.f32 %v1233_v8, 0.0 }
 0x2b8   :  { %v1507_v13 = vpack.c.bf16 %v1451_v10, %v1450_v9 }
 0x2b9   :  { %v1506_v15 = vpack.c.bf16 %v1449_v12, %v1448_v11  ;;  %v2895_v18 = vpop.f32.mrb[48].mxu0 }
 0x2ba   :  { %v1254_v20 = vadd.f32 %v2895_v18, %v3656_v52  ;;  %v1245_v22 = vpop.f32.mrb[49].mxu0 }
 0x2bb   :  { %v1246_v24 = vadd.f32 %v3656_v52, %v1245_v22  ;;  %v2896_v25 = vpop.f32.mrb[50].mxu0  ;;  %2969 = vmatprep.mubr.bf16.mxu1 %v1506_v15 }
 0x2bc   :  { %v1257_v26 = vadd.f32 %v2896_v25, %v3656_v52  ;;  %v1248_v27 = vpop.f32.mrb[51].mxu0  ;;  %2970 = vmatmul.mubr.bf16.gmra.mrb[108].mxu1 %v1507_v13  ;;  %v1454_v29 = vmax.f32 %v1254_v20, 0.0 }
 0x2bd   :  { %v1249_v28 = vadd.f32 %v3656_v52, %v1248_v27  ;;  %v1452_v31 = vmax.f32 %v1246_v24, 0.0 }
 0x2be   :  { %v1455_v30 = vmax.f32 %v1257_v26, 0.0 }
 0x2bf   :  { %v1453_v32 = vmax.f32 %v1249_v28, 0.0 }
 0x2c0   :  { %v1509_v33 = vpack.c.bf16 %v1455_v30, %v1454_v29 }
 0x2c1   :  { %v1508_v34 = vpack.c.bf16 %v1453_v32, %v1452_v31  ;;  %v2899_v35 = vpop.f32.mrb[52].mxu0 }
 0x2c2   :  { %v1270_v36 = vadd.f32 %v2899_v35, %v3656_v52  ;;  %v1261_v37 = vpop.f32.mrb[53].mxu0 }
 0x2c3   :  { %v1262_v38 = vadd.f32 %v3656_v52, %v1261_v37  ;;  %v2900_v42 = vpop.f32.mrb[54].mxu0  ;;  %2973 = vmatprep.mubr.bf16.mxu1 %v1508_v34 }
 0x2c4   :  { %v1273_v21 = vadd.f32 %v2900_v42, %v3656_v52  ;;  %v1264_v23 = vpop.f32.mrb[55].mxu0  ;;  %2974 = vmatmul.mubr.bf16.gmra.mrb[112].mxu1 %v1509_v33  ;;  %v1458_v17 = vmax.f32 %v1270_v36, 0.0 }
 0x2c5   :  { %v1265_v54 = vadd.f32 %v3656_v52, %v1264_v23  ;;  %v1456_v48 = vmax.f32 %v1262_v38, 0.0 }
 0x2c6   :  { %v1459_v19 = vmax.f32 %v1273_v21, 0.0 }
 0x2c7   :  { %v1457_v50 = vmax.f32 %v1265_v54, 0.0 }
 0x2c8   :  { %v1511_v14 = vpack.c.bf16 %v1459_v19, %v1458_v17 }
 0x2c9   :  { %v1510_v16 = vpack.c.bf16 %v1457_v50, %v1456_v48  ;;  %v2903_v39 = vpop.f32.mrb[56].mxu0 }
 0x2ca   :  { %v1286_v40 = vadd.f32 %v2903_v39, %v3656_v52  ;;  %v1277_v41 = vpop.f32.mrb[57].mxu0 }
 0x2cb   :  { %v1278_v43 = vadd.f32 %v3656_v52, %v1277_v41  ;;  %v2904_v44 = vpop.f32.mrb[58].mxu0  ;;  %2977 = vmatprep.mubr.bf16.mxu1 %v1510_v16 }
 0x2cc   :  { %v1289_v45 = vadd.f32 %v2904_v44, %v3656_v52  ;;  %v1280_v46 = vpop.f32.mrb[59].mxu0  ;;  %2978 = vmatmul.mubr.bf16.gmra.mrb[116].mxu1 %v1511_v14  ;;  %v1462_v49 = vmax.f32 %v1286_v40, 0.0 }
 0x2cd   :  { %v1281_v47 = vadd.f32 %v3656_v52, %v1280_v46  ;;  %v1460_v53 = vmax.f32 %v1278_v43, 0.0 }
 0x2ce   :  { %v1463_v51 = vmax.f32 %v1289_v45, 0.0 }
 0x2cf   :  { %v1461_v55 = vmax.f32 %v1281_v47, 0.0 }
 0x2d0   :  { %v1513_v56 = vpack.c.bf16 %v1463_v51, %v1462_v49 }
 0x2d1   :  { %v1512_v57 = vpack.c.bf16 %v1461_v55, %v1460_v53  ;;  %v2907_v58 = vpop.f32.mrb[60].mxu0 }
 0x2d2   :  { %v1302_v59 = vadd.f32 %v2907_v58, %v3656_v52  ;;  %v1293_v60 = vpop.f32.mrb[61].mxu0 }
 0x2d3   :  { %v1294_v61 = vadd.f32 %v3656_v52, %v1293_v60  ;;  %v2908_v62 = vpop.f32.mrb[62].mxu0  ;;  %2981 = vmatprep.mubr.bf16.mxu1 %v1512_v57 }
 0x2d4   :  { %v1305_v63 = vadd.f32 %v2908_v62, %v3656_v52  ;;  %v1296_v0 = vpop.f32.mrb[63].mxu0  ;;  %2982 = vmatmul.mubr.bf16.gmra.mrb[120].mxu1 %v1513_v56  ;;  %v1466_v2 = vmax.f32 %v1302_v59, 0.0 }
 0x2d5   :  { %v1297_v1 = vadd.f32 %v3656_v52, %v1296_v0  ;;  %v1464_v4 = vmax.f32 %v1294_v61, 0.0 }
 0x2d6   :  { %v1467_v3 = vmax.f32 %v1305_v63, 0.0 }
 0x2d7   :  { %v1465_v5 = vmax.f32 %v1297_v1, 0.0 }
 0x2d8   :  { %v1515_v6 = vpack.c.bf16 %v1467_v3, %v1466_v2 }
 0x2d9   :  { %v1514_v7 = vpack.c.bf16 %v1465_v5, %v1464_v4  ;;  %v2911_v8 = vpop.f32.mrb[64].mxu0 }
 0x2da   :  { %v1318_v9 = vadd.f32 %v2911_v8, %v3656_v52  ;;  %v1309_v10 = vpop.f32.mrb[65].mxu0 }
 0x2db   :  { %v1310_v11 = vadd.f32 %v3656_v52, %v1309_v10  ;;  %v2912_v12 = vpop.f32.mrb[66].mxu0  ;;  %2985 = vmatprep.mubr.bf16.mxu1 %v1514_v7 }
 0x2dc   :  { %v1321_v13 = vadd.f32 %v2912_v12, %v3656_v52  ;;  %v1312_v15 = vpop.f32.mrb[67].mxu0  ;;  %2986 = vmatmul.mubr.bf16.gmra.mrb[124].mxu1 %v1515_v6  ;;  %v1470_v20 = vmax.f32 %v1318_v9, 0.0 }
 0x2dd   :  { %v1313_v18 = vadd.f32 %v3656_v52, %v1312_v15  ;;  %v1468_v24 = vmax.f32 %v1310_v11, 0.0 }
 0x2de   :  { %v1471_v22 = vmax.f32 %v1321_v13, 0.0 }
 0x2df   :  { %v1469_v25 = vmax.f32 %v1313_v18, 0.0 }
 0x2e0   :  { %v1517_v26 = vpack.c.bf16 %v1471_v22, %v1470_v20 }
 0x2e1   :  { %v1516_v27 = vpack.c.bf16 %v1469_v25, %v1468_v24  ;;  %v2915_v28 = vpop.f32.mrb[68].mxu0 }
 0x2e2   :  { %v1334_v29 = vadd.f32 %v2915_v28, %v3656_v52  ;;  %v1325_v30 = vpop.f32.mrb[69].mxu0 }
 0x2e3   :  { %v1326_v31 = vadd.f32 %v3656_v52, %v1325_v30  ;;  %v2916_v32 = vpop.f32.mrb[70].mxu0  ;;  %2989 = vmatprep.mubr.bf16.mxu1 %v1516_v27 }
 0x2e4   :  { %v1337_v33 = vadd.f32 %v2916_v32, %v3656_v52  ;;  %v1328_v34 = vpop.f32.mrb[71].mxu0  ;;  %2990 = vmatmul.mubr.bf16.gmra.mrb[128].mxu1 %v1517_v26  ;;  %v1474_v36 = vmax.f32 %v1334_v29, 0.0 }
 0x2e5   :  { %v1329_v35 = vadd.f32 %v3656_v52, %v1328_v34  ;;  %v1472_v38 = vmax.f32 %v1326_v31, 0.0 }
 0x2e6   :  { %v1475_v37 = vmax.f32 %v1337_v33, 0.0 }
 0x2e7   :  { %v1473_v42 = vmax.f32 %v1329_v35, 0.0 }
 0x2e8   :  { %v1519_v21 = vpack.c.bf16 %v1475_v37, %v1474_v36 }
 0x2e9   :  { %v1518_v23 = vpack.c.bf16 %v1473_v42, %v1472_v38  ;;  %v2919_v54 = vpop.f32.mrb[72].mxu0 }
 0x2ea   :  { %v1350_v17 = vadd.f32 %v2919_v54, %v3656_v52  ;;  %v1341_v19 = vpop.f32.mrb[73].mxu0 }
 0x2eb   :  { %v1342_v48 = vadd.f32 %v3656_v52, %v1341_v19  ;;  %v2920_v50 = vpop.f32.mrb[74].mxu0  ;;  %2993 = vmatprep.mubr.bf16.mxu1 %v1518_v23 }
 0x2ec   :  { %v1353_v14 = vadd.f32 %v2920_v50, %v3656_v52  ;;  %v1344_v16 = vpop.f32.mrb[75].mxu0  ;;  %2994 = vmatmul.mubr.bf16.gmra.mrb[132].mxu1 %v1519_v21  ;;  %v1478_v40 = vmax.f32 %v1350_v17, 0.0 }
 0x2ed   :  { %v1345_v39 = vadd.f32 %v3656_v52, %v1344_v16  ;;  %v1476_v43 = vmax.f32 %v1342_v48, 0.0 }
 0x2ee   :  { %v1479_v41 = vmax.f32 %v1353_v14, 0.0 }
 0x2ef   :  { %v1477_v44 = vmax.f32 %v1345_v39, 0.0 }
 0x2f0   :  { %v1521_v45 = vpack.c.bf16 %v1479_v41, %v1478_v40 }
 0x2f1   :  { %v1520_v46 = vpack.c.bf16 %v1477_v44, %v1476_v43  ;;  %v2923_v47 = vpop.f32.mrb[76].mxu0 }
 0x2f2   :  { %v1366_v49 = vadd.f32 %v2923_v47, %v3656_v52  ;;  %v1357_v51 = vpop.f32.mrb[77].mxu0 }
 0x2f3   :  { %v1358_v53 = vadd.f32 %v3656_v52, %v1357_v51  ;;  %v2924_v55 = vpop.f32.mrb[78].mxu0  ;;  %2997 = vmatprep.mubr.bf16.mxu1 %v1520_v46 }
 0x2f4   :  { %v1369_v56 = vadd.f32 %v2924_v55, %v3656_v52  ;;  %v1360_v57 = vpop.f32.mrb[79].mxu0  ;;  %2998 = vmatmul.mubr.bf16.gmra.mrb[136].mxu1 %v1521_v45  ;;  %v1482_v59 = vmax.f32 %v1366_v49, 0.0 }
 0x2f5   :  { %v1361_v58 = vadd.f32 %v3656_v52, %v1360_v57  ;;  %v1480_v61 = vmax.f32 %v1358_v53, 0.0 }
 0x2f6   :  { %v1483_v60 = vmax.f32 %v1369_v56, 0.0 }
 0x2f7   :  { %v1481_v62 = vmax.f32 %v1361_v58, 0.0  ;;  %v3743_v58 = vld [vmem:[%s4137_s4 + $0x3] ss:$0 sm:$0xff] }
 0x2f8   :  { %v1523_v63 = vpack.c.bf16 %v1483_v60, %v1482_v59 }
 0x2f9   :  { %v1522_v0 = vpack.c.bf16 %v1481_v62, %v1480_v61  ;;  %v2927_v1 = vpop.f32.mrb[80].mxu0 }
 0x2fa   :  { %v1382_v2 = vadd.f32 %v2927_v1, %v3656_v52  ;;  %v1373_v3 = vpop.f32.mrb[81].mxu0 }
 0x2fb   :  { %v1374_v4 = vadd.f32 %v3656_v52, %v1373_v3  ;;  %v2928_v5 = vpop.f32.mrb[82].mxu0  ;;  %3001 = vmatprep.mubr.bf16.mxu1 %v1522_v0 }
 0x2fc   :  { %v1385_v6 = vadd.f32 %v2928_v5, %v3656_v52  ;;  %v1376_v7 = vpop.f32.mrb[83].mxu0  ;;  %3002 = vmatmul.mubr.bf16.gmra.mrb[140].mxu1 %v1523_v63  ;;  %v1486_v9 = vmax.f32 %v1382_v2, 0.0 }
 0x2fd   :  { %v1377_v8 = vadd.f32 %v3656_v52, %v1376_v7  ;;  %v1484_v11 = vmax.f32 %v1374_v4, 0.0 }
 0x2fe   :  { %v1487_v10 = vmax.f32 %v1385_v6, 0.0 }
 0x2ff   :  { %v1485_v12 = vmax.f32 %v1377_v8, 0.0 }
 0x300   :  { %v1525_v13 = vpack.c.bf16 %v1487_v10, %v1486_v9 }
 0x301   :  { %v1524_v15 = vpack.c.bf16 %v1485_v12, %v1484_v11  ;;  %v2931_v18 = vpop.f32.mrb[84].mxu0 }
 0x302   :  { %v1398_v20 = vadd.f32 %v2931_v18, %v3656_v52  ;;  %v1389_v22 = vpop.f32.mrb[85].mxu0 }
 0x303   :  { %v1390_v24 = vadd.f32 %v3656_v52, %v1389_v22  ;;  %v2932_v25 = vpop.f32.mrb[86].mxu0  ;;  %3005 = vmatprep.mubr.bf16.mxu1 %v1524_v15 }
 0x304   :  { %v1401_v26 = vadd.f32 %v2932_v25, %v3656_v52  ;;  %v1392_v27 = vpop.f32.mrb[87].mxu0  ;;  %3006 = vmatmul.mubr.bf16.gmra.mrb[144].mxu1 %v1525_v13  ;;  %v1490_v29 = vmax.f32 %v1398_v20, 0.0 }
 0x305   :  { %v1393_v28 = vadd.f32 %v3656_v52, %v1392_v27  ;;  %v1488_v31 = vmax.f32 %v1390_v24, 0.0 }
 0x306   :  { %v1491_v30 = vmax.f32 %v1401_v26, 0.0 }
 0x307   :  { %v1489_v32 = vmax.f32 %v1393_v28, 0.0 }
 0x308   :  { %v1527_v33 = vpack.c.bf16 %v1491_v30, %v1490_v29 }
 0x309   :  { %v1526_v34 = vpack.c.bf16 %v1489_v32, %v1488_v31  ;;  %v2935_v35 = vpop.f32.mrb[88].mxu0 }
 0x30a   :  { %v1414_v36 = vadd.f32 %v2935_v35, %v3656_v52  ;;  %v1405_v37 = vpop.f32.mrb[89].mxu0 }
 0x30b   :  { %v1406_v38 = vadd.f32 %v3656_v52, %v1405_v37  ;;  %v2936_v42 = vpop.f32.mrb[90].mxu0  ;;  %3009 = vmatprep.mubr.bf16.mxu1 %v1526_v34 }
 0x30c   :  { %v1417_v21 = vadd.f32 %v2936_v42, %v3656_v52  ;;  %v1408_v23 = vpop.f32.mrb[91].mxu0  ;;  %3010 = vmatmul.mubr.bf16.gmra.mrb[148].mxu1 %v1527_v33  ;;  %v1494_v17 = vmax.f32 %v1414_v36, 0.0 }
 0x30d   :  { %v1409_v54 = vadd.f32 %v3656_v52, %v1408_v23  ;;  %v1492_v48 = vmax.f32 %v1406_v38, 0.0 }
 0x30e   :  { %v1495_v19 = vmax.f32 %v1417_v21, 0.0 }
 0x30f   :  { %v1493_v50 = vmax.f32 %v1409_v54, 0.0 }
 0x310   :  { %v1529_v14 = vpack.c.bf16 %v1495_v19, %v1494_v17 }
 0x311   :  { %v1528_v16 = vpack.c.bf16 %v1493_v50, %v1492_v48  ;;  %v2939_v39 = vpop.f32.mrb[92].mxu0 }
 0x312   :  { %v1430_v40 = vadd.f32 %v2939_v39, %v3656_v52  ;;  %v1421_v41 = vpop.f32.mrb[93].mxu0 }
 0x313   :  { %v1422_v43 = vadd.f32 %v3656_v52, %v1421_v41  ;;  %v2940_v44 = vpop.f32.mrb[94].mxu0  ;;  %3013 = vmatprep.mubr.bf16.mxu1 %v1528_v16 }
 0x314   :  { %v1433_v45 = vadd.f32 %v2940_v44, %v3656_v52  ;;  %v1424_v46 = vpop.f32.mrb[95].mxu0  ;;  %3014 = vmatmul.mubr.bf16.gmra.mrb[152].mxu1 %v1529_v14  ;;  %v1498_v49 = vmax.f32 %v1430_v40, 0.0 }
 0x315   :  { %v1425_v47 = vadd.f32 %v3656_v52, %v1424_v46  ;;  %v1496_v53 = vmax.f32 %v1422_v43, 0.0 }
 0x316   :  { %v1499_v51 = vmax.f32 %v1433_v45, 0.0 }
 0x317   :  { %v1497_v55 = vmax.f32 %v1425_v47, 0.0 }
 0x318   :  { %v1531_v56 = vpack.c.bf16 %v1499_v51, %v1498_v49 }
 0x319   :  { %v1530_v57 = vpack.c.bf16 %v1497_v55, %v1496_v53 }
 0x31b   :  { %3017 = vmatprep.mubr.bf16.mxu1 %v1530_v57 }
 0x31c   :  { %3018 = vmatmul.mubr.bf16.gmra.mrb[156].mxu1 %v1531_v56 }
 0x377   :  { %v2959_v59 = vpop.f32.mrb[96].mxu1 }
 0x378   :  { %v1645_v60 = vadd.f32 %v2959_v59, %v3743_v58  ;;  %v1636_v61 = vpop.f32.mrb[97].mxu1 }
 0x379   :  { %v1637_v62 = vadd.f32 %v3743_v58, %v1636_v61  ;;  %v2960_v52 = vpop.f32.mrb[98].mxu1 }
 0x37a   :  { %v1648_v63 = vadd.f32 %v2960_v52, %v3743_v58  ;;  %v1639_v0 = vpop.f32.mrb[99].mxu1  ;;  %v1893_v2 = vmax.f32 %v1645_v60, 0.0 }
 0x37b   :  { %v1640_v1 = vadd.f32 %v3743_v58, %v1639_v0  ;;  %v1891_v4 = vmax.f32 %v1637_v62, 0.0 }
 0x37c   :  { %v1894_v3 = vmax.f32 %v1648_v63, 0.0 }
 0x37d   :  { %v1892_v5 = vmax.f32 %v1640_v1, 0.0 }
 0x37e   :  { %v1956_v6 = vpack.c.bf16 %v1894_v3, %v1893_v2 }
 0x37f   :  { %v1955_v7 = vpack.c.bf16 %v1892_v5, %v1891_v4  ;;  %v2963_v8 = vpop.f32.mrb[100].mxu1 }
 0x380   :  { %v1661_v9 = vadd.f32 %v2963_v8, %v3743_v58  ;;  %v1652_v10 = vpop.f32.mrb[101].mxu1 }
 0x381   :  { %v1653_v11 = vadd.f32 %v3743_v58, %v1652_v10  ;;  %v2964_v12 = vpop.f32.mrb[102].mxu1  ;;  %3037 = vmatprep.mubr.bf16.mxu0 %v1955_v7 }
 0x382   :  { %v1664_v13 = vadd.f32 %v2964_v12, %v3743_v58  ;;  %v1655_v15 = vpop.f32.mrb[103].mxu1  ;;  %3038 = vmatmul.mubr.bf16.vlgmr.msra.gmra.mrb[96].mxu0 %v1956_v6  ;;  %v1897_v20 = vmax.f32 %v1661_v9, 0.0 }
 0x383   :  { %v1656_v18 = vadd.f32 %v3743_v58, %v1655_v15  ;;  %v1895_v24 = vmax.f32 %v1653_v11, 0.0 }
 0x384   :  { %v1898_v22 = vmax.f32 %v1664_v13, 0.0 }
 0x385   :  { %v1896_v25 = vmax.f32 %v1656_v18, 0.0 }
 0x386   :  { %v1958_v26 = vpack.c.bf16 %v1898_v22, %v1897_v20 }
 0x387   :  { %v1957_v27 = vpack.c.bf16 %v1896_v25, %v1895_v24  ;;  %v2967_v28 = vpop.f32.mrb[104].mxu1 }
 0x388   :  { %v1677_v29 = vadd.f32 %v2967_v28, %v3743_v58  ;;  %v1668_v30 = vpop.f32.mrb[105].mxu1 }
 0x389   :  { %v1669_v31 = vadd.f32 %v3743_v58, %v1668_v30  ;;  %v2968_v32 = vpop.f32.mrb[106].mxu1  ;;  %3041 = vmatprep.mubr.bf16.mxu0 %v1957_v27 }
 0x38a   :  { %v1680_v33 = vadd.f32 %v2968_v32, %v3743_v58  ;;  %v1671_v34 = vpop.f32.mrb[107].mxu1  ;;  %3042 = vmatmul.mubr.bf16.gmra.mrb[100].mxu0 %v1958_v26  ;;  %v1901_v36 = vmax.f32 %v1677_v29, 0.0 }
 0x38b   :  { %v1672_v35 = vadd.f32 %v3743_v58, %v1671_v34  ;;  %v1899_v38 = vmax.f32 %v1669_v31, 0.0 }
 0x38c   :  { %v1902_v37 = vmax.f32 %v1680_v33, 0.0 }
 0x38d   :  { %v1900_v42 = vmax.f32 %v1672_v35, 0.0 }
 0x38e   :  { %v1960_v21 = vpack.c.bf16 %v1902_v37, %v1901_v36 }
 0x38f   :  { %v1959_v23 = vpack.c.bf16 %v1900_v42, %v1899_v38  ;;  %v2971_v54 = vpop.f32.mrb[108].mxu1 }
 0x390   :  { %v1693_v17 = vadd.f32 %v2971_v54, %v3743_v58  ;;  %v1684_v19 = vpop.f32.mrb[109].mxu1 }
 0x391   :  { %v1685_v48 = vadd.f32 %v3743_v58, %v1684_v19  ;;  %v2972_v50 = vpop.f32.mrb[110].mxu1  ;;  %3045 = vmatprep.mubr.bf16.mxu0 %v1959_v23 }
 0x392   :  { %v1696_v14 = vadd.f32 %v2972_v50, %v3743_v58  ;;  %v1687_v16 = vpop.f32.mrb[111].mxu1  ;;  %3046 = vmatmul.mubr.bf16.gmra.mrb[104].mxu0 %v1960_v21  ;;  %v1905_v40 = vmax.f32 %v1693_v17, 0.0 }
 0x393   :  { %v1688_v39 = vadd.f32 %v3743_v58, %v1687_v16  ;;  %v1903_v43 = vmax.f32 %v1685_v48, 0.0 }
 0x394   :  { %v1906_v41 = vmax.f32 %v1696_v14, 0.0 }
 0x395   :  { %v1904_v44 = vmax.f32 %v1688_v39, 0.0 }
 0x396   :  { %v1962_v45 = vpack.c.bf16 %v1906_v41, %v1905_v40 }
 0x397   :  { %v1961_v46 = vpack.c.bf16 %v1904_v44, %v1903_v43  ;;  %v2975_v47 = vpop.f32.mrb[112].mxu1 }
 0x398   :  { %v1709_v49 = vadd.f32 %v2975_v47, %v3743_v58  ;;  %v1700_v51 = vpop.f32.mrb[113].mxu1 }
 0x399   :  { %v1701_v53 = vadd.f32 %v3743_v58, %v1700_v51  ;;  %v2976_v55 = vpop.f32.mrb[114].mxu1  ;;  %3049 = vmatprep.mubr.bf16.mxu0 %v1961_v46 }
 0x39a   :  { %v1712_v56 = vadd.f32 %v2976_v55, %v3743_v58  ;;  %v1703_v57 = vpop.f32.mrb[115].mxu1  ;;  %3050 = vmatmul.mubr.bf16.gmra.mrb[108].mxu0 %v1962_v45  ;;  %v1909_v60 = vmax.f32 %v1709_v49, 0.0 }
 0x39b   :  { %v1704_v59 = vadd.f32 %v3743_v58, %v1703_v57  ;;  %v1907_v62 = vmax.f32 %v1701_v53, 0.0 }
 0x39c   :  { %v1910_v61 = vmax.f32 %v1712_v56, 0.0 }
 0x39d   :  { %v1908_v52 = vmax.f32 %v1704_v59, 0.0 }
 0x39e   :  { %v1964_v63 = vpack.c.bf16 %v1910_v61, %v1909_v60 }
 0x39f   :  { %v1963_v0 = vpack.c.bf16 %v1908_v52, %v1907_v62  ;;  %v2979_v1 = vpop.f32.mrb[116].mxu1 }
 0x3a0   :  { %v1725_v2 = vadd.f32 %v2979_v1, %v3743_v58  ;;  %v1716_v3 = vpop.f32.mrb[117].mxu1 }
 0x3a1   :  { %v1717_v4 = vadd.f32 %v3743_v58, %v1716_v3  ;;  %v2980_v5 = vpop.f32.mrb[118].mxu1  ;;  %3053 = vmatprep.mubr.bf16.mxu0 %v1963_v0 }
 0x3a2   :  { %v1728_v6 = vadd.f32 %v2980_v5, %v3743_v58  ;;  %v1719_v7 = vpop.f32.mrb[119].mxu1  ;;  %3054 = vmatmul.mubr.bf16.gmra.mrb[112].mxu0 %v1964_v63  ;;  %v1913_v9 = vmax.f32 %v1725_v2, 0.0 }
 0x3a3   :  { %v1720_v8 = vadd.f32 %v3743_v58, %v1719_v7  ;;  %v1911_v11 = vmax.f32 %v1717_v4, 0.0 }
 0x3a4   :  { %v1914_v10 = vmax.f32 %v1728_v6, 0.0 }
 0x3a5   :  { %v1912_v12 = vmax.f32 %v1720_v8, 0.0 }
 0x3a6   :  { %v1966_v13 = vpack.c.bf16 %v1914_v10, %v1913_v9 }
 0x3a7   :  { %v1965_v15 = vpack.c.bf16 %v1912_v12, %v1911_v11  ;;  %v2983_v18 = vpop.f32.mrb[120].mxu1 }
 0x3a8   :  { %v1741_v20 = vadd.f32 %v2983_v18, %v3743_v58  ;;  %v1732_v22 = vpop.f32.mrb[121].mxu1 }
 0x3a9   :  { %v1733_v24 = vadd.f32 %v3743_v58, %v1732_v22  ;;  %v2984_v25 = vpop.f32.mrb[122].mxu1  ;;  %3057 = vmatprep.mubr.bf16.mxu0 %v1965_v15 }
 0x3aa   :  { %v1744_v26 = vadd.f32 %v2984_v25, %v3743_v58  ;;  %v1735_v27 = vpop.f32.mrb[123].mxu1  ;;  %3058 = vmatmul.mubr.bf16.gmra.mrb[116].mxu0 %v1966_v13  ;;  %v1917_v29 = vmax.f32 %v1741_v20, 0.0 }
 0x3ab   :  { %v1736_v28 = vadd.f32 %v3743_v58, %v1735_v27  ;;  %v1915_v31 = vmax.f32 %v1733_v24, 0.0 }
 0x3ac   :  { %v1918_v30 = vmax.f32 %v1744_v26, 0.0 }
 0x3ad   :  { %v1916_v32 = vmax.f32 %v1736_v28, 0.0 }
 0x3ae   :  { %v1968_v33 = vpack.c.bf16 %v1918_v30, %v1917_v29 }
 0x3af   :  { %v1967_v34 = vpack.c.bf16 %v1916_v32, %v1915_v31  ;;  %v2987_v35 = vpop.f32.mrb[124].mxu1 }
 0x3b0   :  { %v1757_v36 = vadd.f32 %v2987_v35, %v3743_v58  ;;  %v1748_v37 = vpop.f32.mrb[125].mxu1 }
 0x3b1   :  { %v1749_v38 = vadd.f32 %v3743_v58, %v1748_v37  ;;  %v2988_v42 = vpop.f32.mrb[126].mxu1  ;;  %3061 = vmatprep.mubr.bf16.mxu0 %v1967_v34 }
 0x3b2   :  { %v1760_v21 = vadd.f32 %v2988_v42, %v3743_v58  ;;  %v1751_v23 = vpop.f32.mrb[127].mxu1  ;;  %3062 = vmatmul.mubr.bf16.gmra.mrb[120].mxu0 %v1968_v33  ;;  %v1921_v17 = vmax.f32 %v1757_v36, 0.0 }
 0x3b3   :  { %v1752_v54 = vadd.f32 %v3743_v58, %v1751_v23  ;;  %v1919_v48 = vmax.f32 %v1749_v38, 0.0 }
 0x3b4   :  { %v1922_v19 = vmax.f32 %v1760_v21, 0.0 }
 0x3b5   :  { %v1920_v50 = vmax.f32 %v1752_v54, 0.0 }
 0x3b6   :  { %v1970_v14 = vpack.c.bf16 %v1922_v19, %v1921_v17 }
 0x3b7   :  { %v1969_v16 = vpack.c.bf16 %v1920_v50, %v1919_v48  ;;  %v2991_v39 = vpop.f32.mrb[128].mxu1 }
 0x3b8   :  { %v1773_v40 = vadd.f32 %v2991_v39, %v3743_v58  ;;  %v1764_v41 = vpop.f32.mrb[129].mxu1 }
 0x3b9   :  { %v1765_v43 = vadd.f32 %v3743_v58, %v1764_v41  ;;  %v2992_v44 = vpop.f32.mrb[130].mxu1  ;;  %3065 = vmatprep.mubr.bf16.mxu0 %v1969_v16 }
 0x3ba   :  { %v1776_v45 = vadd.f32 %v2992_v44, %v3743_v58  ;;  %v1767_v46 = vpop.f32.mrb[131].mxu1  ;;  %3066 = vmatmul.mubr.bf16.gmra.mrb[124].mxu0 %v1970_v14  ;;  %v1925_v49 = vmax.f32 %v1773_v40, 0.0 }
 0x3bb   :  { %v1768_v47 = vadd.f32 %v3743_v58, %v1767_v46  ;;  %v1923_v53 = vmax.f32 %v1765_v43, 0.0 }
 0x3bc   :  { %v1926_v51 = vmax.f32 %v1776_v45, 0.0 }
 0x3bd   :  { %v1924_v55 = vmax.f32 %v1768_v47, 0.0 }
 0x3be   :  { %v1972_v56 = vpack.c.bf16 %v1926_v51, %v1925_v49 }
 0x3bf   :  { %v1971_v57 = vpack.c.bf16 %v1924_v55, %v1923_v53  ;;  %v2995_v59 = vpop.f32.mrb[132].mxu1 }
 0x3c0   :  { %v1789_v60 = vadd.f32 %v2995_v59, %v3743_v58  ;;  %v1780_v61 = vpop.f32.mrb[133].mxu1 }
 0x3c1   :  { %v1781_v62 = vadd.f32 %v3743_v58, %v1780_v61  ;;  %v2996_v52 = vpop.f32.mrb[134].mxu1  ;;  %3069 = vmatprep.mubr.bf16.mxu0 %v1971_v57 }
 0x3c2   :  { %v1792_v63 = vadd.f32 %v2996_v52, %v3743_v58  ;;  %v1783_v0 = vpop.f32.mrb[135].mxu1  ;;  %3070 = vmatmul.mubr.bf16.gmra.mrb[128].mxu0 %v1972_v56  ;;  %v1929_v2 = vmax.f32 %v1789_v60, 0.0 }
 0x3c3   :  { %v1784_v1 = vadd.f32 %v3743_v58, %v1783_v0  ;;  %v1927_v4 = vmax.f32 %v1781_v62, 0.0 }
 0x3c4   :  { %v1930_v3 = vmax.f32 %v1792_v63, 0.0 }
 0x3c5   :  { %v1928_v5 = vmax.f32 %v1784_v1, 0.0 }
 0x3c6   :  { %v1974_v6 = vpack.c.bf16 %v1930_v3, %v1929_v2 }
 0x3c7   :  { %v1973_v7 = vpack.c.bf16 %v1928_v5, %v1927_v4  ;;  %v2999_v8 = vpop.f32.mrb[136].mxu1 }
 0x3c8   :  { %v1805_v9 = vadd.f32 %v2999_v8, %v3743_v58  ;;  %v1796_v10 = vpop.f32.mrb[137].mxu1 }
 0x3c9   :  { %v1797_v11 = vadd.f32 %v3743_v58, %v1796_v10  ;;  %v3000_v12 = vpop.f32.mrb[138].mxu1  ;;  %3073 = vmatprep.mubr.bf16.mxu0 %v1973_v7 }
 0x3ca   :  { %v1808_v13 = vadd.f32 %v3000_v12, %v3743_v58  ;;  %v1799_v15 = vpop.f32.mrb[139].mxu1  ;;  %3074 = vmatmul.mubr.bf16.gmra.mrb[132].mxu0 %v1974_v6  ;;  %v1933_v20 = vmax.f32 %v1805_v9, 0.0 }
 0x3cb   :  { %v1800_v18 = vadd.f32 %v3743_v58, %v1799_v15  ;;  %v1931_v24 = vmax.f32 %v1797_v11, 0.0 }
 0x3cc   :  { %v1934_v22 = vmax.f32 %v1808_v13, 0.0 }
 0x3cd   :  { %v1932_v25 = vmax.f32 %v1800_v18, 0.0 }
 0x3ce   :  { %v1976_v26 = vpack.c.bf16 %v1934_v22, %v1933_v20 }
 0x3cf   :  { %v1975_v27 = vpack.c.bf16 %v1932_v25, %v1931_v24  ;;  %v3003_v28 = vpop.f32.mrb[140].mxu1 }
 0x3d0   :  { %v1821_v29 = vadd.f32 %v3003_v28, %v3743_v58  ;;  %v1812_v30 = vpop.f32.mrb[141].mxu1 }
 0x3d1   :  { %v1813_v31 = vadd.f32 %v3743_v58, %v1812_v30  ;;  %v3004_v32 = vpop.f32.mrb[142].mxu1  ;;  %3077 = vmatprep.mubr.bf16.mxu0 %v1975_v27 }
 0x3d2   :  { %v1824_v33 = vadd.f32 %v3004_v32, %v3743_v58  ;;  %v1815_v34 = vpop.f32.mrb[143].mxu1  ;;  %3078 = vmatmul.mubr.bf16.gmra.mrb[136].mxu0 %v1976_v26  ;;  %v1937_v36 = vmax.f32 %v1821_v29, 0.0 }
 0x3d3   :  { %v1816_v35 = vadd.f32 %v3743_v58, %v1815_v34  ;;  %v1935_v38 = vmax.f32 %v1813_v31, 0.0 }
 0x3d4   :  { %v1938_v37 = vmax.f32 %v1824_v33, 0.0 }
 0x3d5   :  { %v1936_v42 = vmax.f32 %v1816_v35, 0.0  ;;  %v3812_v35 = vld [vmem:[%s4139_s5] ss:$0 sm:$0xff] }
 0x3d6   :  { %v1978_v21 = vpack.c.bf16 %v1938_v37, %v1937_v36 }
 0x3d7   :  { %v1977_v23 = vpack.c.bf16 %v1936_v42, %v1935_v38  ;;  %v3007_v54 = vpop.f32.mrb[144].mxu1 }
 0x3d8   :  { %v1837_v17 = vadd.f32 %v3007_v54, %v3743_v58  ;;  %v1828_v19 = vpop.f32.mrb[145].mxu1 }
 0x3d9   :  { %v1829_v48 = vadd.f32 %v3743_v58, %v1828_v19  ;;  %v3008_v50 = vpop.f32.mrb[146].mxu1  ;;  %3081 = vmatprep.mubr.bf16.mxu0 %v1977_v23 }
 0x3da   :  { %v1840_v14 = vadd.f32 %v3008_v50, %v3743_v58  ;;  %v1831_v16 = vpop.f32.mrb[147].mxu1  ;;  %3082 = vmatmul.mubr.bf16.gmra.mrb[140].mxu0 %v1978_v21  ;;  %v1941_v40 = vmax.f32 %v1837_v17, 0.0 }
 0x3db   :  { %v1832_v39 = vadd.f32 %v3743_v58, %v1831_v16  ;;  %v1939_v43 = vmax.f32 %v1829_v48, 0.0 }
 0x3dc   :  { %v1942_v41 = vmax.f32 %v1840_v14, 0.0 }
 0x3dd   :  { %v1940_v44 = vmax.f32 %v1832_v39, 0.0 }
 0x3de   :  { %v1980_v45 = vpack.c.bf16 %v1942_v41, %v1941_v40 }
 0x3df   :  { %v1979_v46 = vpack.c.bf16 %v1940_v44, %v1939_v43  ;;  %v3011_v47 = vpop.f32.mrb[148].mxu1 }
 0x3e0   :  { %v1853_v49 = vadd.f32 %v3011_v47, %v3743_v58  ;;  %v1844_v51 = vpop.f32.mrb[149].mxu1 }
 0x3e1   :  { %v1845_v53 = vadd.f32 %v3743_v58, %v1844_v51  ;;  %v3012_v55 = vpop.f32.mrb[150].mxu1  ;;  %3085 = vmatprep.mubr.bf16.mxu0 %v1979_v46 }
 0x3e2   :  { %v1856_v56 = vadd.f32 %v3012_v55, %v3743_v58  ;;  %v1847_v57 = vpop.f32.mrb[151].mxu1  ;;  %3086 = vmatmul.mubr.bf16.gmra.mrb[144].mxu0 %v1980_v45  ;;  %v1945_v60 = vmax.f32 %v1853_v49, 0.0 }
 0x3e3   :  { %v1848_v59 = vadd.f32 %v3743_v58, %v1847_v57  ;;  %v1943_v62 = vmax.f32 %v1845_v53, 0.0 }
 0x3e4   :  { %v1946_v61 = vmax.f32 %v1856_v56, 0.0 }
 0x3e5   :  { %v1944_v52 = vmax.f32 %v1848_v59, 0.0 }
 0x3e6   :  { %v1982_v63 = vpack.c.bf16 %v1946_v61, %v1945_v60 }
 0x3e7   :  { %v1981_v0 = vpack.c.bf16 %v1944_v52, %v1943_v62  ;;  %v3015_v1 = vpop.f32.mrb[152].mxu1 }
 0x3e8   :  { %v1869_v2 = vadd.f32 %v3015_v1, %v3743_v58  ;;  %v1860_v3 = vpop.f32.mrb[153].mxu1 }
 0x3e9   :  { %v1861_v4 = vadd.f32 %v3743_v58, %v1860_v3  ;;  %v3016_v5 = vpop.f32.mrb[154].mxu1  ;;  %3089 = vmatprep.mubr.bf16.mxu0 %v1981_v0 }
 0x3ea   :  { %v1872_v6 = vadd.f32 %v3016_v5, %v3743_v58  ;;  %v1863_v7 = vpop.f32.mrb[155].mxu1  ;;  %3090 = vmatmul.mubr.bf16.gmra.mrb[148].mxu0 %v1982_v63  ;;  %v1949_v9 = vmax.f32 %v1869_v2, 0.0 }
 0x3eb   :  { %v1864_v8 = vadd.f32 %v3743_v58, %v1863_v7  ;;  %v1947_v11 = vmax.f32 %v1861_v4, 0.0 }
 0x3ec   :  { %v1950_v10 = vmax.f32 %v1872_v6, 0.0 }
 0x3ed   :  { %v1948_v12 = vmax.f32 %v1864_v8, 0.0 }
 0x3ee   :  { %v1984_v13 = vpack.c.bf16 %v1950_v10, %v1949_v9 }
 0x3ef   :  { %v1983_v15 = vpack.c.bf16 %v1948_v12, %v1947_v11  ;;  %v3019_v18 = vpop.f32.mrb[156].mxu1 }
 0x3f0   :  { %v1885_v20 = vadd.f32 %v3019_v18, %v3743_v58  ;;  %v1876_v22 = vpop.f32.mrb[157].mxu1 }
 0x3f1   :  { %v1877_v24 = vadd.f32 %v3743_v58, %v1876_v22  ;;  %v3020_v25 = vpop.f32.mrb[158].mxu1  ;;  %3093 = vmatprep.mubr.bf16.mxu0 %v1983_v15 }
 0x3f2   :  { %v1888_v26 = vadd.f32 %v3020_v25, %v3743_v58  ;;  %v1879_v27 = vpop.f32.mrb[159].mxu1  ;;  %3094 = vmatmul.mubr.bf16.gmra.mrb[152].mxu0 %v1984_v13  ;;  %v1953_v29 = vmax.f32 %v1885_v20, 0.0 }
 0x3f3   :  { %v1880_v28 = vadd.f32 %v3743_v58, %v1879_v27  ;;  %v1951_v31 = vmax.f32 %v1877_v24, 0.0 }
 0x3f4   :  { %v1954_v30 = vmax.f32 %v1888_v26, 0.0 }
 0x3f5   :  { %v1952_v32 = vmax.f32 %v1880_v28, 0.0 }
 0x3f6   :  { %v1986_v33 = vpack.c.bf16 %v1954_v30, %v1953_v29 }
 0x3f7   :  { %v1985_v34 = vpack.c.bf16 %v1952_v32, %v1951_v31 }
 0x3f9   :  { %3097 = vmatprep.mubr.bf16.mxu0 %v1985_v34 }
 0x3fa   :  { %3098 = vmatmul.mubr.bf16.gmra.mrb[156].mxu0 %v1986_v33 }
 0x455   :  { %v3039_v36 = vpop.f32.mrb[96].mxu0 }
 0x456   :  { %v2101_v37 = vadd.f32 %v3039_v36, %v3812_v35  ;;  %v2092_v38 = vpop.f32.mrb[97].mxu0 }
 0x457   :  { %v2093_v58 = vadd.f32 %v3812_v35, %v2092_v38  ;;  %v3040_v42 = vpop.f32.mrb[98].mxu0 }
 0x458   :  { %2350 = vst.msk [vmem:[%s4140_s6 + $0x10] sm:$0xff] %vm2347_vm1, %v2101_v37  ;;  %v2104_v21 = vadd.f32 %v3040_v42, %v3812_v35  ;;  %v2095_v23 = vpop.f32.mrb[99].mxu0 }
 0x459   :  { %2348 = vst.msk [vmem:[%s4140_s6] sm:$0xff] %vm2347_vm1, %v2093_v58  ;;  %v2096_v54 = vadd.f32 %v3812_v35, %v2095_v23 }
 0x45a   :  { %2351 = vst.msk [vmem:[%s4140_s6 + $0x18] sm:$0xff] %vm2347_vm1, %v2104_v21 }
 0x45b   :  { %2349 = vst.msk [vmem:[%s4140_s6 + $0x8] sm:$0xff] %vm2347_vm1, %v2096_v54 }
 0x45d   :  { %v3043_v17 = vpop.f32.mrb[100].mxu0 }
 0x45e   :  { %v2117_v19 = vadd.f32 %v3043_v17, %v3812_v35  ;;  %v2108_v48 = vpop.f32.mrb[101].mxu0 }
 0x45f   :  { %v2109_v50 = vadd.f32 %v3812_v35, %v2108_v48  ;;  %v3044_v14 = vpop.f32.mrb[102].mxu0 }
 0x460   :  { %2354 = vst.msk [vmem:[%s4140_s6 + $0x30] sm:$0xff] %vm2347_vm1, %v2117_v19  ;;  %v2120_v16 = vadd.f32 %v3044_v14, %v3812_v35  ;;  %v2111_v39 = vpop.f32.mrb[103].mxu0 }
 0x461   :  { %2352 = vst.msk [vmem:[%s4140_s6 + $0x20] sm:$0xff] %vm2347_vm1, %v2109_v50  ;;  %v2112_v40 = vadd.f32 %v3812_v35, %v2111_v39 }
 0x462   :  { %2355 = vst.msk [vmem:[%s4140_s6 + $0x38] sm:$0xff] %vm2347_vm1, %v2120_v16 }
 0x463   :  { %2353 = vst.msk [vmem:[%s4140_s6 + $0x28] sm:$0xff] %vm2347_vm1, %v2112_v40 }
 0x465   :  { %v3047_v41 = vpop.f32.mrb[104].mxu0 }
 0x466   :  { %v2133_v43 = vadd.f32 %v3047_v41, %v3812_v35  ;;  %v2124_v44 = vpop.f32.mrb[105].mxu0 }
 0x467   :  { %v2125_v45 = vadd.f32 %v3812_v35, %v2124_v44  ;;  %v3048_v46 = vpop.f32.mrb[106].mxu0 }
 0x468   :  { %2358 = vst.msk [vmem:[%s4140_s6 + $0x50] sm:$0xff] %vm2347_vm1, %v2133_v43  ;;  %v2136_v47 = vadd.f32 %v3048_v46, %v3812_v35  ;;  %v2127_v49 = vpop.f32.mrb[107].mxu0 }
 0x469   :  { %2356 = vst.msk [vmem:[%s4140_s6 + $0x40] sm:$0xff] %vm2347_vm1, %v2125_v45  ;;  %v2128_v51 = vadd.f32 %v3812_v35, %v2127_v49 }
 0x46a   :  { %2359 = vst.msk [vmem:[%s4140_s6 + $0x58] sm:$0xff] %vm2347_vm1, %v2136_v47 }
 0x46b   :  { %2357 = vst.msk [vmem:[%s4140_s6 + $0x48] sm:$0xff] %vm2347_vm1, %v2128_v51 }
 0x46d   :  { %v3051_v53 = vpop.f32.mrb[108].mxu0 }
 0x46e   :  { %v2149_v55 = vadd.f32 %v3051_v53, %v3812_v35  ;;  %v2140_v56 = vpop.f32.mrb[109].mxu0 }
 0x46f   :  { %v2141_v57 = vadd.f32 %v3812_v35, %v2140_v56  ;;  %v3052_v59 = vpop.f32.mrb[110].mxu0 }
 0x470   :  { %2362 = vst.msk [vmem:[%s4140_s6 + $0x70] sm:$0xff] %vm2347_vm1, %v2149_v55  ;;  %v2152_v60 = vadd.f32 %v3052_v59, %v3812_v35  ;;  %v2143_v61 = vpop.f32.mrb[111].mxu0 }
 0x471   :  { %2360 = vst.msk [vmem:[%s4140_s6 + $0x60] sm:$0xff] %vm2347_vm1, %v2141_v57  ;;  %v2144_v62 = vadd.f32 %v3812_v35, %v2143_v61 }
 0x472   :  { %2363 = vst.msk [vmem:[%s4140_s6 + $0x78] sm:$0xff] %vm2347_vm1, %v2152_v60 }
 0x473   :  { %2361 = vst.msk [vmem:[%s4140_s6 + $0x68] sm:$0xff] %vm2347_vm1, %v2144_v62 }
 0x475   :  { %v3055_v52 = vpop.f32.mrb[112].mxu0 }
 0x476   :  { %v2165_v63 = vadd.f32 %v3055_v52, %v3812_v35  ;;  %v2156_v0 = vpop.f32.mrb[113].mxu0 }
 0x477   :  { %v2157_v1 = vadd.f32 %v3812_v35, %v2156_v0  ;;  %v3056_v2 = vpop.f32.mrb[114].mxu0 }
 0x478   :  { %2366 = vst.msk [vmem:[%s4140_s6 + $0x90] sm:$0xff] %vm2347_vm1, %v2165_v63  ;;  %v2168_v3 = vadd.f32 %v3056_v2, %v3812_v35  ;;  %v2159_v4 = vpop.f32.mrb[115].mxu0 }
 0x479   :  { %2364 = vst.msk [vmem:[%s4140_s6 + $0x80] sm:$0xff] %vm2347_vm1, %v2157_v1  ;;  %v2160_v5 = vadd.f32 %v3812_v35, %v2159_v4 }
 0x47a   :  { %2367 = vst.msk [vmem:[%s4140_s6 + $0x98] sm:$0xff] %vm2347_vm1, %v2168_v3 }
 0x47b   :  { %2365 = vst.msk [vmem:[%s4140_s6 + $0x88] sm:$0xff] %vm2347_vm1, %v2160_v5 }
 0x47d   :  { %v3059_v6 = vpop.f32.mrb[116].mxu0 }
 0x47e   :  { %v2181_v7 = vadd.f32 %v3059_v6, %v3812_v35  ;;  %v2172_v8 = vpop.f32.mrb[117].mxu0 }
 0x47f   :  { %v2173_v9 = vadd.f32 %v3812_v35, %v2172_v8  ;;  %v3060_v10 = vpop.f32.mrb[118].mxu0 }
 0x480   :  { %2370 = vst.msk [vmem:[%s4140_s6 + $0xb0] sm:$0xff] %vm2347_vm1, %v2181_v7  ;;  %v2184_v11 = vadd.f32 %v3060_v10, %v3812_v35  ;;  %v2175_v12 = vpop.f32.mrb[119].mxu0 }
 0x481   :  { %2368 = vst.msk [vmem:[%s4140_s6 + $0xa0] sm:$0xff] %vm2347_vm1, %v2173_v9  ;;  %v2176_v13 = vadd.f32 %v3812_v35, %v2175_v12 }
 0x482   :  { %2371 = vst.msk [vmem:[%s4140_s6 + $0xb8] sm:$0xff] %vm2347_vm1, %v2184_v11 }
 0x483   :  { %2369 = vst.msk [vmem:[%s4140_s6 + $0xa8] sm:$0xff] %vm2347_vm1, %v2176_v13 }
 0x485   :  { %v3063_v15 = vpop.f32.mrb[120].mxu0 }
 0x486   :  { %v2197_v18 = vadd.f32 %v3063_v15, %v3812_v35  ;;  %v2188_v20 = vpop.f32.mrb[121].mxu0 }
 0x487   :  { %v2189_v22 = vadd.f32 %v3812_v35, %v2188_v20  ;;  %v3064_v24 = vpop.f32.mrb[122].mxu0 }
 0x488   :  { %2374 = vst.msk [vmem:[%s4140_s6 + $0xd0] sm:$0xff] %vm2347_vm1, %v2197_v18  ;;  %v2200_v25 = vadd.f32 %v3064_v24, %v3812_v35  ;;  %v2191_v26 = vpop.f32.mrb[123].mxu0 }
 0x489   :  { %2372 = vst.msk [vmem:[%s4140_s6 + $0xc0] sm:$0xff] %vm2347_vm1, %v2189_v22  ;;  %v2192_v27 = vadd.f32 %v3812_v35, %v2191_v26 }
 0x48a   :  { %2375 = vst.msk [vmem:[%s4140_s6 + $0xd8] sm:$0xff] %vm2347_vm1, %v2200_v25 }
 0x48b   :  { %2373 = vst.msk [vmem:[%s4140_s6 + $0xc8] sm:$0xff] %vm2347_vm1, %v2192_v27 }
 0x48d   :  { %v3067_v28 = vpop.f32.mrb[124].mxu0 }
 0x48e   :  { %v2213_v29 = vadd.f32 %v3067_v28, %v3812_v35  ;;  %v2204_v30 = vpop.f32.mrb[125].mxu0 }
 0x48f   :  { %v2205_v31 = vadd.f32 %v3812_v35, %v2204_v30  ;;  %v3068_v32 = vpop.f32.mrb[126].mxu0 }
 0x490   :  { %2378 = vst.msk [vmem:[%s4140_s6 + $0xf0] sm:$0xff] %vm2347_vm1, %v2213_v29  ;;  %v2216_v33 = vadd.f32 %v3068_v32, %v3812_v35  ;;  %v2207_v34 = vpop.f32.mrb[127].mxu0 }
 0x491   :  { %2376 = vst.msk [vmem:[%s4140_s6 + $0xe0] sm:$0xff] %vm2347_vm1, %v2205_v31  ;;  %v2208_v36 = vadd.f32 %v3812_v35, %v2207_v34 }
 0x492   :  { %2379 = vst.msk [vmem:[%s4140_s6 + $0xf8] sm:$0xff] %vm2347_vm1, %v2216_v33 }
 0x493   :  { %2377 = vst.msk [vmem:[%s4140_s6 + $0xe8] sm:$0xff] %vm2347_vm1, %v2208_v36 }
 0x495   :  { %v3071_v37 = vpop.f32.mrb[128].mxu0 }
 0x496   :  { %v2229_v38 = vadd.f32 %v3071_v37, %v3812_v35  ;;  %v2220_v58 = vpop.f32.mrb[129].mxu0 }
 0x497   :  { %v2221_v42 = vadd.f32 %v3812_v35, %v2220_v58  ;;  %v3072_v21 = vpop.f32.mrb[130].mxu0 }
 0x498   :  { %2382 = vst.msk [vmem:[%s4140_s6 + $0x110] sm:$0xff] %vm2347_vm1, %v2229_v38  ;;  %v2232_v23 = vadd.f32 %v3072_v21, %v3812_v35  ;;  %v2223_v54 = vpop.f32.mrb[131].mxu0 }
 0x499   :  { %2380 = vst.msk [vmem:[%s4140_s6 + $0x100] sm:$0xff] %vm2347_vm1, %v2221_v42  ;;  %v2224_v17 = vadd.f32 %v3812_v35, %v2223_v54 }
 0x49a   :  { %2383 = vst.msk [vmem:[%s4140_s6 + $0x118] sm:$0xff] %vm2347_vm1, %v2232_v23 }
 0x49b   :  { %2381 = vst.msk [vmem:[%s4140_s6 + $0x108] sm:$0xff] %vm2347_vm1, %v2224_v17 }
 0x49d   :  { %v3075_v19 = vpop.f32.mrb[132].mxu0 }
 0x49e   :  { %v2245_v48 = vadd.f32 %v3075_v19, %v3812_v35  ;;  %v2236_v50 = vpop.f32.mrb[133].mxu0 }
 0x49f   :  { %v2237_v14 = vadd.f32 %v3812_v35, %v2236_v50  ;;  %v3076_v16 = vpop.f32.mrb[134].mxu0 }
 0x4a0   :  { %2386 = vst.msk [vmem:[%s4140_s6 + $0x130] sm:$0xff] %vm2347_vm1, %v2245_v48  ;;  %v2248_v39 = vadd.f32 %v3076_v16, %v3812_v35  ;;  %v2239_v40 = vpop.f32.mrb[135].mxu0 }
 0x4a1   :  { %2384 = vst.msk [vmem:[%s4140_s6 + $0x120] sm:$0xff] %vm2347_vm1, %v2237_v14  ;;  %v2240_v41 = vadd.f32 %v3812_v35, %v2239_v40 }
 0x4a2   :  { %2387 = vst.msk [vmem:[%s4140_s6 + $0x138] sm:$0xff] %vm2347_vm1, %v2248_v39 }
 0x4a3   :  { %2385 = vst.msk [vmem:[%s4140_s6 + $0x128] sm:$0xff] %vm2347_vm1, %v2240_v41 }
 0x4a5   :  { %v3079_v43 = vpop.f32.mrb[136].mxu0 }
 0x4a6   :  { %v2261_v44 = vadd.f32 %v3079_v43, %v3812_v35  ;;  %v2252_v45 = vpop.f32.mrb[137].mxu0 }
 0x4a7   :  { %v2253_v46 = vadd.f32 %v3812_v35, %v2252_v45  ;;  %v3080_v47 = vpop.f32.mrb[138].mxu0 }
 0x4a8   :  { %2390 = vst.msk [vmem:[%s4140_s6 + $0x150] sm:$0xff] %vm2347_vm1, %v2261_v44  ;;  %v2264_v49 = vadd.f32 %v3080_v47, %v3812_v35  ;;  %v2255_v51 = vpop.f32.mrb[139].mxu0 }
 0x4a9   :  { %2388 = vst.msk [vmem:[%s4140_s6 + $0x140] sm:$0xff] %vm2347_vm1, %v2253_v46  ;;  %v2256_v53 = vadd.f32 %v3812_v35, %v2255_v51 }
 0x4aa   :  { %2391 = vst.msk [vmem:[%s4140_s6 + $0x158] sm:$0xff] %vm2347_vm1, %v2264_v49 }
 0x4ab   :  { %2389 = vst.msk [vmem:[%s4140_s6 + $0x148] sm:$0xff] %vm2347_vm1, %v2256_v53 }
 0x4ad   :  { %v3083_v55 = vpop.f32.mrb[140].mxu0 }
 0x4ae   :  { %v2277_v56 = vadd.f32 %v3083_v55, %v3812_v35  ;;  %v2268_v57 = vpop.f32.mrb[141].mxu0 }
 0x4af   :  { %v2269_v59 = vadd.f32 %v3812_v35, %v2268_v57  ;;  %v3084_v60 = vpop.f32.mrb[142].mxu0 }
 0x4b0   :  { %2394 = vst.msk [vmem:[%s4140_s6 + $0x170] sm:$0xff] %vm2347_vm1, %v2277_v56  ;;  %v2280_v61 = vadd.f32 %v3084_v60, %v3812_v35  ;;  %v2271_v62 = vpop.f32.mrb[143].mxu0 }
 0x4b1   :  { %2392 = vst.msk [vmem:[%s4140_s6 + $0x160] sm:$0xff] %vm2347_vm1, %v2269_v59  ;;  %v2272_v52 = vadd.f32 %v3812_v35, %v2271_v62 }
 0x4b2   :  { %2395 = vst.msk [vmem:[%s4140_s6 + $0x178] sm:$0xff] %vm2347_vm1, %v2280_v61 }
 0x4b3   :  { %2393 = vst.msk [vmem:[%s4140_s6 + $0x168] sm:$0xff] %vm2347_vm1, %v2272_v52 }
 0x4b5   :  { %v3087_v63 = vpop.f32.mrb[144].mxu0 }
 0x4b6   :  { %v2293_v0 = vadd.f32 %v3087_v63, %v3812_v35  ;;  %v2284_v1 = vpop.f32.mrb[145].mxu0 }
 0x4b7   :  { %v2285_v2 = vadd.f32 %v3812_v35, %v2284_v1  ;;  %v3088_v3 = vpop.f32.mrb[146].mxu0 }
 0x4b8   :  { %2398 = vst.msk [vmem:[%s4140_s6 + $0x190] sm:$0xff] %vm2347_vm1, %v2293_v0  ;;  %v2296_v4 = vadd.f32 %v3088_v3, %v3812_v35  ;;  %v2287_v5 = vpop.f32.mrb[147].mxu0 }
 0x4b9   :  { %2396 = vst.msk [vmem:[%s4140_s6 + $0x180] sm:$0xff] %vm2347_vm1, %v2285_v2  ;;  %v2288_v6 = vadd.f32 %v3812_v35, %v2287_v5 }
 0x4ba   :  { %2399 = vst.msk [vmem:[%s4140_s6 + $0x198] sm:$0xff] %vm2347_vm1, %v2296_v4 }
 0x4bb   :  { %2397 = vst.msk [vmem:[%s4140_s6 + $0x188] sm:$0xff] %vm2347_vm1, %v2288_v6 }
 0x4bd   :  { %v3091_v7 = vpop.f32.mrb[148].mxu0 }
 0x4be   :  { %v2309_v8 = vadd.f32 %v3091_v7, %v3812_v35  ;;  %v2300_v9 = vpop.f32.mrb[149].mxu0 }
 0x4bf   :  { %v2301_v10 = vadd.f32 %v3812_v35, %v2300_v9  ;;  %v3092_v11 = vpop.f32.mrb[150].mxu0 }
 0x4c0   :  { %2402 = vst.msk [vmem:[%s4140_s6 + $0x1b0] sm:$0xff] %vm2347_vm1, %v2309_v8  ;;  %v2312_v12 = vadd.f32 %v3092_v11, %v3812_v35  ;;  %v2303_v13 = vpop.f32.mrb[151].mxu0 }
 0x4c1   :  { %2400 = vst.msk [vmem:[%s4140_s6 + $0x1a0] sm:$0xff] %vm2347_vm1, %v2301_v10  ;;  %v2304_v15 = vadd.f32 %v3812_v35, %v2303_v13 }
 0x4c2   :  { %2403 = vst.msk [vmem:[%s4140_s6 + $0x1b8] sm:$0xff] %vm2347_vm1, %v2312_v12 }
 0x4c3   :  { %2401 = vst.msk [vmem:[%s4140_s6 + $0x1a8] sm:$0xff] %vm2347_vm1, %v2304_v15 }
 0x4c5   :  { %v3095_v18 = vpop.f32.mrb[152].mxu0 }
 0x4c6   :  { %v2325_v20 = vadd.f32 %v3095_v18, %v3812_v35  ;;  %v2316_v22 = vpop.f32.mrb[153].mxu0 }
 0x4c7   :  { %v2317_v24 = vadd.f32 %v3812_v35, %v2316_v22  ;;  %v3096_v25 = vpop.f32.mrb[154].mxu0 }
 0x4c8   :  { %2406 = vst.msk [vmem:[%s4140_s6 + $0x1d0] sm:$0xff] %vm2347_vm1, %v2325_v20  ;;  %v2328_v26 = vadd.f32 %v3096_v25, %v3812_v35  ;;  %v2319_v27 = vpop.f32.mrb[155].mxu0 }
 0x4c9   :  { %2404 = vst.msk [vmem:[%s4140_s6 + $0x1c0] sm:$0xff] %vm2347_vm1, %v2317_v24  ;;  %v2320_v28 = vadd.f32 %v3812_v35, %v2319_v27 }
 0x4ca   :  { %2407 = vst.msk [vmem:[%s4140_s6 + $0x1d8] sm:$0xff] %vm2347_vm1, %v2328_v26 }
 0x4cb   :  { %2405 = vst.msk [vmem:[%s4140_s6 + $0x1c8] sm:$0xff] %vm2347_vm1, %v2320_v28 }
 0x4cd   :  { %v3099_v29 = vpop.f32.mrb[156].mxu0 }
 0x4ce   :  { %v2341_v30 = vadd.f32 %v3099_v29, %v3812_v35  ;;  %v2332_v31 = vpop.f32.mrb[157].mxu0 }
 0x4cf   :  { %v2333_v32 = vadd.f32 %v3812_v35, %v2332_v31  ;;  %v3100_v33 = vpop.f32.mrb[158].mxu0 }
 0x4d0   :  { %2410 = vst.msk [vmem:[%s4140_s6 + $0x1f0] sm:$0xff] %vm2347_vm1, %v2341_v30  ;;  %v2344_v34 = vadd.f32 %v3100_v33, %v3812_v35  ;;  %v2335_v36 = vpop.f32.mrb[159].mxu0 }
 0x4d1   :  { %2408 = vst.msk [vmem:[%s4140_s6 + $0x1e0] sm:$0xff] %vm2347_vm1, %v2333_v32  ;;  %v2336_v37 = vadd.f32 %v3812_v35, %v2335_v36 }
 0x4d2   :  { %2411 = vst.msk [vmem:[%s4140_s6 + $0x1f8] sm:$0xff] %vm2347_vm1, %v2344_v34 }
 0x4d3   :  { %2409 = vst.msk [vmem:[%s4140_s6 + $0x1e8] sm:$0xff] %vm2347_vm1, %v2336_v37 }

</bundles_post_ra>
